<compile_context>
chip_gen: v6e
topology: v6e:2x2x1
jax: 0.10.0
libtpu: 0.0.40
codegen_flags: <defaults>
</compile_context>

<pallas_src>
import jax
import jax.numpy as jnp
from jax import lax
from jax.experimental import pallas as pl
from jax.experimental.pallas import tpu as pltpu

EPS = 1e-5  # nn.BatchNorm2d default


def _round_up(x, m):
    return (x + m - 1) // m * m


def _make_conv3x3(C, Cp, H, W, B, P):
    """3x3 'same' conv over B images packed along the lane axis.

    Caller fills xpad_ref[:, P : P + B*H*W] with the (already activated)
    input, one image after another.  This builds the (9*Cp, B*H*W) im2col
    slab with hoisted boundary masks and runs a single MXU matmul
    (M=C, K=9*Cp, N=B*H*W), returning a lane-dense (C, B*H*W) result.
    """
    HW = H * W
    L = B * HW

    def conv3x3(w_packed, xpad_ref, stack_ref):
        # Hoisted boundary masks: 1 iota + 4 compares per conv (not per tap).
        pos = lax.broadcasted_iota(jnp.int32, (1, L), 1)
        if (W & (W - 1)) == 0 and (HW & (HW - 1)) == 0:
            col = pos & (W - 1)        # column within a row  (no int divide)
            rpos = pos & (HW - 1)      # position within an image
        else:
            col = pos % W
            rpos = pos % HW
        row_mask = {-1: rpos >= W, 0: None, 1: rpos < HW - W}
        col_mask = {-1: col >= 1, 0: None, 1: col <= W - 2}

        for t in range(9):
            ky, kx = divmod(t, 3)
            dy, dx = ky - 1, kx - 1
            tap = xpad_ref[:, pl.ds(P + dy * W + dx, L)]
            m, cm = row_mask[dy], col_mask[dx]
            if m is None:
                m = cm
            elif cm is not None:
                m = m & cm
            if m is not None:                       # also kills cross-image reads
                tap = jnp.where(m, tap, 0.0)
            if Cp != C:
                # Pad to a full 8-sublane multiple with explicit zeros so the
                # store is a single aligned unmasked vst and the matching
                # zero weight columns never see uninitialized VMEM.
                tap = jnp.concatenate(
                    [tap, jnp.zeros((Cp - C, L), tap.dtype)], axis=0)
            stack_ref[pl.ds(t * Cp, Cp), :] = tap

        # Single matmul per conv: M=C, K=9*Cp, N=B*HW (lane-dense output).
        return jnp.dot(w_packed, stack_ref[...],
                       preferred_element_type=jnp.float32)

    return conv3x3


@jax.jit
def resblock_forward(x_nchw, params):
    """Pallas ResBlock forward. x_nchw: (N, C, H, W) float32 -> (N, C, H, W)."""
    w1, g1, b1, w2, g2, b2 = params
    N, C, H, W = x_nchw.shape
    HW = H * W
    Cp = _round_up(C, 8)                 # sublane-aligned per-tap block
    P = _round_up(W + 1, 128)            # halo width (lane-aligned writes)

    # Batch tile: largest divisor of N whose per-step working set fits a
    # conservative budget (keeps double-buffering alive even on v7x's smaller
    # VMEM).  For real channel counts, add spatial row-tiling here.
    slab_per_img = 9 * Cp * HW * 4
    io_per_img = 6 * C * HW * 4
    B_tile = 1
    for b in range(1, N + 1):
        if N % b == 0 and b * (slab_per_img + io_per_img) <= (4 << 20):
            B_tile = b
    G = N // B_tile
    L = B_tile * HW
    inv_count = 1.0 / float(N * HW)

    x = x_nchw.reshape(N, C, HW)         # free reshape (stays contiguous)

    def pack_w(w):
        # OIHW -> (Cout, ky, kx, Cin), zero-pad Cin -> Cp, flatten to
        # (Cout, 9*Cp): matches the im2col slab row order (tap-major).
        wr = jnp.transpose(w, (0, 2, 3, 1))
        wr = jnp.pad(wr, ((0, 0), (0, 0), (0, 0), (0, Cp - C)))
        return wr.reshape(C, 9 * Cp)

    w1p, w2p = pack_w(w1), pack_w(w2)
    g1c, b1c = g1.reshape(C, 1), b1.reshape(C, 1)
    g2c, b2c = g2.reshape(C, 1), b2.reshape(C, 1)

    conv3x3 = _make_conv3x3(C, Cp, H, W, B_tile, P)

    def zero_halo(xpad_ref):
        # Cheap per-step zeroing: no uninitialized VMEM is ever read and no
        # cross-step scratch state exists (safe under megacore splitting).
        xpad_ref[:, pl.ds(0, P)] = jnp.zeros((C, P), jnp.float32)
        xpad_ref[:, pl.ds(P + L, P)] = jnp.zeros((C, P), jnp.float32)

    def write_stats(stat_ref, y):
        stat_ref[0, :, 0:1] = jnp.sum(y, axis=1, keepdims=True)
        stat_ref[0, :, 1:2] = jnp.sum(y * y, axis=1, keepdims=True)

    def bn_scale_shift(stats_ref, g_ref, bt_ref):
        # Fold train-mode BN batch stats into per-channel scale/shift.
        # (Single-pass E[x^2]-E[x]^2 variance in f32; fine at these scales.)
        s = jnp.sum(stats_ref[...], axis=0)            # (C, 2) over all steps
        mean = s[:, 0:1] * inv_count
        var = s[:, 1:2] * inv_count - mean * mean
        scale = g_ref[...] * lax.rsqrt(var + EPS)      # (C, 1)
        shift = bt_ref[...] - mean * scale
        return scale, shift

    def conv1_kernel(x_ref, w_ref, y_ref, stat_ref, xpad_ref, stack_ref):
        zero_halo(xpad_ref)
        for bi in range(B_tile):
            xpad_ref[:, pl.ds(P + bi * HW, HW)] = x_ref[bi]
        y = conv3x3(w_ref[...], xpad_ref, stack_ref)
        for bi in range(B_tile):
            y_ref[bi] = y[:, bi * HW:(bi + 1) * HW]
        write_stats(stat_ref, y)

    def conv2_kernel(y1_ref, s1_ref, g_ref, bt_ref, w_ref, y_ref, stat_ref,
                     xpad_ref, stack_ref):
        zero_halo(xpad_ref)
        scale, shift = bn_scale_shift(s1_ref, g_ref, bt_ref)
        for bi in range(B_tile):
            # bn1 folded to one FMA, then ReLU, written straight into the halo buf.
            xpad_ref[:, pl.ds(P + bi * HW, HW)] = jnp.maximum(
                y1_ref[bi] * scale + shift, 0.0)
        y = conv3x3(w_ref[...], xpad_ref, stack_ref)
        for bi in range(B_tile):
            y_ref[bi] = y[:, bi * HW:(bi + 1) * HW]
        write_stats(stat_ref, y)

    def finish_kernel(y2_ref, x_ref, s2_ref, g_ref, bt_ref, o_ref):
        scale, shift = bn_scale_shift(s2_ref, g_ref, bt_ref)
        o_ref[...] = jnp.maximum(y2_ref[...] * scale + shift + x_ref[...], 0.0)

    img = pl.BlockSpec((B_tile, C, HW), lambda i: (i, 0, 0))
    wgt = pl.BlockSpec((C, 9 * Cp), lambda i: (0, 0))
    vec = pl.BlockSpec((C, 1), lambda i: (0, 0))
    stat_in = pl.BlockSpec((G, C, 2), lambda i: (0, 0, 0))
    stat_out = pl.BlockSpec((1, C, 2), lambda i: (i, 0, 0))
    cparams = pltpu.CompilerParams(dimension_semantics=("parallel",))
    conv_scratch = [pltpu.VMEM((C, L + 2 * P), jnp.float32),   # halo'ed rows
                    pltpu.VMEM((9 * Cp, L), jnp.float32)]      # im2col slab
    img_f32 = jax.ShapeDtypeStruct((N, C, HW), jnp.float32)
    stat_f32 = jax.ShapeDtypeStruct((G, C, 2), jnp.float32)

    y1, s1 = pl.pallas_call(
        conv1_kernel, grid=(G,),
        in_specs=[img, wgt], out_specs=[img, stat_out],
        out_shape=[img_f32, stat_f32],
        scratch_shapes=conv_scratch, compiler_params=cparams)(x, w1p)

    y2, s2 = pl.pallas_call(
        conv2_kernel, grid=(G,),
        in_specs=[img, stat_in, vec, vec, wgt], out_specs=[img, stat_out],
        out_shape=[img_f32, stat_f32],
        scratch_shapes=conv_scratch, compiler_params=cparams)(
            y1, s1, g1c, b1c, w2p)

    out = pl.pallas_call(
        finish_kernel, grid=(G,),
        in_specs=[img, img, stat_in, vec, vec], out_specs=img,
        out_shape=img_f32,
        input_output_aliases={0: 0},        # result written in place of y2
        compiler_params=cparams)(y2, x, s2, g2c, b2c)

    return out.reshape(N, C, H, W)


def resblock_reference(x, params):
    """Pure-JAX reference matching the PyTorch forward (train-mode BN)."""
    w1, g1, b1, w2, g2, b2 = params

    def conv(x, w):
        return lax.conv_general_dilated(
            x, w, window_strides=(1, 1), padding='SAME',
            dimension_numbers=('NCHW', 'OIHW', 'NCHW'))

    def bn(y, g, b):
        mean = jnp.mean(y, axis=(0, 2, 3), keepdims=True)
        var = jnp.mean((y - mean) ** 2, axis=(0, 2, 3), keepdims=True)
        return ((y - mean) * lax.rsqrt(var + EPS)
                * g.reshape(1, -1, 1, 1) + b.reshape(1, -1, 1, 1))

    residual = x
    y = jax.nn.relu(bn(conv(x, w1), g1, b1))
    y = bn(conv(y, w2), g2, b2)
    return jax.nn.relu(y + residual)


if __name__ == "__main__":
    N, C, H, W = 2, 4, 16, 16
    key = jax.random.PRNGKey(0)
    kx, k1, k2, kg1, kb1, kg2, kb2 = jax.random.split(key, 7)

    x = jax.random.normal(kx, (N, C, H, W), jnp.float32)
    # Deterministic synthetic parameters (shapes from ResBlock.__init__).
    w1 = 0.2 * jax.random.normal(k1, (C, C, 3, 3), jnp.float32)   # OIHW, no bias
    w2 = 0.2 * jax.random.normal(k2, (C, C, 3, 3), jnp.float32)
    g1 = 1.0 + 0.1 * jax.random.normal(kg1, (C,), jnp.float32)
    b1 = 0.1 * jax.random.normal(kb1, (C,), jnp.float32)
    g2 = 1.0 + 0.1 * jax.random.normal(kg2, (C,), jnp.float32)
    b2 = 0.1 * jax.random.normal(kb2, (C,), jnp.float32)
    params = (w1, g1, b1, w2, g2, b2)

    out = jax.block_until_ready(resblock_forward(x, params))
    ref = resblock_reference(x, params)

    assert out.shape == x.shape, (out.shape, x.shape)
    max_err = float(jnp.max(jnp.abs(out - ref)))
    assert jnp.allclose(out, ref, atol=1e-4, rtol=1e-4), max_err
    print("KERNEL_OK")
</pallas_src>

<mosaic_0001>
module attributes {stable_mosaic.version = 11 : i64} {
  func.func @conv1_kernel(%arg0: i32, %arg1: memref<2x4x256xf32, #tpu.memory_space<vmem>>, %arg2: memref<4x72xf32, #tpu.memory_space<vmem>>, %arg3: memref<2x4x256xf32, #tpu.memory_space<vmem>>, %arg4: memref<1x4x2xf32, #tpu.memory_space<vmem>>, %arg5: memref<4x768xf32, #tpu.memory_space<vmem>>, %arg6: memref<72x512xf32, #tpu.memory_space<vmem>>) attributes {dimension_semantics = [#tpu.dimension_semantics<parallel>], iteration_bounds = array<i64: 1>, scalar_prefetch = 0 : i64, scratch_operands = 2 : i64, tpu.core_type = #tpu.core_type<tc>, window_params = [{transform_indices = @transform_0, window_bounds = array<i64: 2, 4, 256>}, {pipeline_mode = #tpu.pipeline_mode<synchronous>, transform_indices = @transform_1, window_bounds = array<i64: 4, 72>}, {transform_indices = @transform_2, window_bounds = array<i64: 2, 4, 256>}, {transform_indices = @transform_3, window_bounds = array<i64: 1, 4, 2>}]} {
    %cst = arith.constant 0.000000e+00 : f32
    %0 = vector.broadcast %cst : f32 to vector<4x128xf32>
    %c0 = arith.constant 0 : index
    %c0_0 = arith.constant 0 : index
    %1 = vector.load %arg5[%c0, %c0_0] : memref<4x768xf32, #tpu.memory_space<vmem>>, vector<4x128xf32>
    tpu.vector_store %arg5[%c0, %c0_0], %0 {strides = array<i32>} : memref<4x768xf32, #tpu.memory_space<vmem>>, vector<4x128xf32>,
    %cst_1 = arith.constant 0.000000e+00 : f32
    %2 = vector.broadcast %cst_1 : f32 to vector<4x128xf32>
    %c0_2 = arith.constant 0 : index
    %c640 = arith.constant 640 : index
    %3 = vector.load %arg5[%c0_2, %c640] : memref<4x768xf32, #tpu.memory_space<vmem>>, vector<4x128xf32>
    tpu.vector_store %arg5[%c0_2, %c640], %2 {strides = array<i32>} : memref<4x768xf32, #tpu.memory_space<vmem>>, vector<4x128xf32>,
    %c0_3 = arith.constant 0 : index
    %c0_4 = arith.constant 0 : index
    %c0_5 = arith.constant 0 : index
    %4 = vector.load %arg1[%c0_3, %c0_4, %c0_5] : memref<2x4x256xf32, #tpu.memory_space<vmem>>, vector<1x4x256xf32>
    %5 = vector.shape_cast %4 : vector<1x4x256xf32> to vector<4x256xf32>
    %c0_6 = arith.constant 0 : index
    %c128 = arith.constant 128 : index
    %6 = vector.load %arg5[%c0_6, %c128] : memref<4x768xf32, #tpu.memory_space<vmem>>, vector<4x256xf32>
    tpu.vector_store %arg5[%c0_6, %c128], %5 {strides = array<i32>} : memref<4x768xf32, #tpu.memory_space<vmem>>, vector<4x256xf32>,
    %c1 = arith.constant 1 : index
    %c0_7 = arith.constant 0 : index
    %c0_8 = arith.constant 0 : index
    %7 = vector.load %arg1[%c1, %c0_7, %c0_8] : memref<2x4x256xf32, #tpu.memory_space<vmem>>, vector<1x4x256xf32>
    %8 = vector.shape_cast %7 : vector<1x4x256xf32> to vector<4x256xf32>
    %c0_9 = arith.constant 0 : index
    %c384 = arith.constant 384 : index
    %9 = vector.load %arg5[%c0_9, %c384] : memref<4x768xf32, #tpu.memory_space<vmem>>, vector<4x256xf32>
    tpu.vector_store %arg5[%c0_9, %c384], %8 {strides = array<i32>} : memref<4x768xf32, #tpu.memory_space<vmem>>, vector<4x256xf32>,
    %c0_10 = arith.constant 0 : index
    %c0_11 = arith.constant 0 : index
    %10 = vector.load %arg2[%c0_10, %c0_11] : memref<4x72xf32, #tpu.memory_space<vmem>>, vector<4x72xf32>
    %11 = tpu.iota {dimensions = array<i32: 1>} : vector<1x512xi32>
    %c15_i32 = arith.constant 15 : i32
    %12 = vector.broadcast %c15_i32 : i32 to vector<1x512xi32>
    %13 = arith.andi %11, %12 : vector<1x512xi32>
    %c255_i32 = arith.constant 255 : i32
    %14 = vector.broadcast %c255_i32 : i32 to vector<1x512xi32>
    %15 = arith.andi %11, %14 : vector<1x512xi32>
    %c16_i32 = arith.constant 16 : i32
    %16 = vector.broadcast %c16_i32 : i32 to vector<1x512xi32>
    %17 = arith.cmpi sge, %15, %16 : vector<1x512xi32>
    %c240_i32 = arith.constant 240 : i32
    %18 = vector.broadcast %c240_i32 : i32 to vector<1x512xi32>
    %19 = arith.cmpi slt, %15, %18 : vector<1x512xi32>
    %c1_i32 = arith.constant 1 : i32
    %20 = vector.broadcast %c1_i32 : i32 to vector<1x512xi32>
    %21 = arith.cmpi sge, %13, %20 : vector<1x512xi32>
    %c14_i32 = arith.constant 14 : i32
    %22 = vector.broadcast %c14_i32 : i32 to vector<1x512xi32>
    %23 = arith.cmpi sle, %13, %22 : vector<1x512xi32>
    %c0_12 = arith.constant 0 : index
    %c111 = arith.constant 111 : index
    %24 = vector.load %arg5[%c0_12, %c111] : memref<4x768xf32, #tpu.memory_space<vmem>>, vector<4x512xf32>
    %25 = arith.andi %17, %21 : vector<1x512xi1>
    %cst_13 = arith.constant 0.000000e+00 : f32
    %26 = vector.shape_cast %25 : vector<1x512xi1> to vector<1x512xi1>
    %27 = vector.broadcast %26 : vector<1x512xi1> to vector<4x512xi1>
    %28 = vector.broadcast %cst_13 : f32 to vector<4x512xf32>
    %29 = arith.select %27, %24, %28 : vector<4x512xi1>, vector<4x512xf32>
    %cst_14 = arith.constant 0.000000e+00 : f32
    %30 = vector.broadcast %cst_14 : f32 to vector<4x512xf32>
    %31 = tpu.concatenate %29, %30 in 0 : vector<4x512xf32>, vector<4x512xf32> -> vector<8x512xf32>
    %c0_15 = arith.constant 0 : index
    %c0_16 = arith.constant 0 : index
    %32 = vector.load %arg6[%c0_15, %c0_16] : memref<72x512xf32, #tpu.memory_space<vmem>>, vector<8x512xf32>
    tpu.vector_store %arg6[%c0_15, %c0_16], %31 {strides = array<i32>} : memref<72x512xf32, #tpu.memory_space<vmem>>, vector<8x512xf32>,
    %c0_17 = arith.constant 0 : index
    %c112 = arith.constant 112 : index
    %33 = vector.load %arg5[%c0_17, %c112] : memref<4x768xf32, #tpu.memory_space<vmem>>, vector<4x512xf32>
    %cst_18 = arith.constant 0.000000e+00 : f32
    %34 = vector.shape_cast %17 : vector<1x512xi1> to vector<1x512xi1>
    %35 = vector.broadcast %34 : vector<1x512xi1> to vector<4x512xi1>
    %36 = vector.broadcast %cst_18 : f32 to vector<4x512xf32>
    %37 = arith.select %35, %33, %36 : vector<4x512xi1>, vector<4x512xf32>
    %cst_19 = arith.constant 0.000000e+00 : f32
    %38 = vector.broadcast %cst_19 : f32 to vector<4x512xf32>
    %39 = tpu.concatenate %37, %38 in 0 : vector<4x512xf32>, vector<4x512xf32> -> vector<8x512xf32>
    %c8 = arith.constant 8 : index
    %c0_20 = arith.constant 0 : index
    %40 = vector.load %arg6[%c8, %c0_20] : memref<72x512xf32, #tpu.memory_space<vmem>>, vector<8x512xf32>
    tpu.vector_store %arg6[%c8, %c0_20], %39 {strides = array<i32>} : memref<72x512xf32, #tpu.memory_space<vmem>>, vector<8x512xf32>,
    %c0_21 = arith.constant 0 : index
    %c113 = arith.constant 113 : index
    %41 = vector.load %arg5[%c0_21, %c113] : memref<4x768xf32, #tpu.memory_space<vmem>>, vector<4x512xf32>
    %42 = arith.andi %17, %23 : vector<1x512xi1>
    %cst_22 = arith.constant 0.000000e+00 : f32
    %43 = vector.shape_cast %42 : vector<1x512xi1> to vector<1x512xi1>
    %44 = vector.broadcast %43 : vector<1x512xi1> to vector<4x512xi1>
    %45 = vector.broadcast %cst_22 : f32 to vector<4x512xf32>
    %46 = arith.select %44, %41, %45 : vector<4x512xi1>, vector<4x512xf32>
    %cst_23 = arith.constant 0.000000e+00 : f32
    %47 = vector.broadcast %cst_23 : f32 to vector<4x512xf32>
    %48 = tpu.concatenate %46, %47 in 0 : vector<4x512xf32>, vector<4x512xf32> -> vector<8x512xf32>
    %c16 = arith.constant 16 : index
    %c0_24 = arith.constant 0 : index
    %49 = vector.load %arg6[%c16, %c0_24] : memref<72x512xf32, #tpu.memory_space<vmem>>, vector<8x512xf32>
    tpu.vector_store %arg6[%c16, %c0_24], %48 {strides = array<i32>} : memref<72x512xf32, #tpu.memory_space<vmem>>, vector<8x512xf32>,
    %c0_25 = arith.constant 0 : index
    %c127 = arith.constant 127 : index
    %50 = vector.load %arg5[%c0_25, %c127] : memref<4x768xf32, #tpu.memory_space<vmem>>, vector<4x512xf32>
    %cst_26 = arith.constant 0.000000e+00 : f32
    %51 = vector.shape_cast %21 : vector<1x512xi1> to vector<1x512xi1>
    %52 = vector.broadcast %51 : vector<1x512xi1> to vector<4x512xi1>
    %53 = vector.broadcast %cst_26 : f32 to vector<4x512xf32>
    %54 = arith.select %52, %50, %53 : vector<4x512xi1>, vector<4x512xf32>
    %cst_27 = arith.constant 0.000000e+00 : f32
    %55 = vector.broadcast %cst_27 : f32 to vector<4x512xf32>
    %56 = tpu.concatenate %54, %55 in 0 : vector<4x512xf32>, vector<4x512xf32> -> vector<8x512xf32>
    %c24 = arith.constant 24 : index
    %c0_28 = arith.constant 0 : index
    %57 = vector.load %arg6[%c24, %c0_28] : memref<72x512xf32, #tpu.memory_space<vmem>>, vector<8x512xf32>
    tpu.vector_store %arg6[%c24, %c0_28], %56 {strides = array<i32>} : memref<72x512xf32, #tpu.memory_space<vmem>>, vector<8x512xf32>,
    %c0_29 = arith.constant 0 : index
    %c128_30 = arith.constant 128 : index
    %58 = vector.load %arg5[%c0_29, %c128_30] : memref<4x768xf32, #tpu.memory_space<vmem>>, vector<4x512xf32>
    %cst_31 = arith.constant 0.000000e+00 : f32
    %59 = vector.broadcast %cst_31 : f32 to vector<4x512xf32>
    %60 = tpu.concatenate %58, %59 in 0 : vector<4x512xf32>, vector<4x512xf32> -> vector<8x512xf32>
    %c32 = arith.constant 32 : index
    %c0_32 = arith.constant 0 : index
    %61 = vector.load %arg6[%c32, %c0_32] : memref<72x512xf32, #tpu.memory_space<vmem>>, vector<8x512xf32>
    tpu.vector_store %arg6[%c32, %c0_32], %60 {strides = array<i32>} : memref<72x512xf32, #tpu.memory_space<vmem>>, vector<8x512xf32>,
    %c0_33 = arith.constant 0 : index
    %c129 = arith.constant 129 : index
    %62 = vector.load %arg5[%c0_33, %c129] : memref<4x768xf32, #tpu.memory_space<vmem>>, vector<4x512xf32>
    %cst_34 = arith.constant 0.000000e+00 : f32
    %63 = vector.shape_cast %23 : vector<1x512xi1> to vector<1x512xi1>
    %64 = vector.broadcast %63 : vector<1x512xi1> to vector<4x512xi1>
    %65 = vector.broadcast %cst_34 : f32 to vector<4x512xf32>
    %66 = arith.select %64, %62, %65 : vector<4x512xi1>, vector<4x512xf32>
    %cst_35 = arith.constant 0.000000e+00 : f32
    %67 = vector.broadcast %cst_35 : f32 to vector<4x512xf32>
    %68 = tpu.concatenate %66, %67 in 0 : vector<4x512xf32>, vector<4x512xf32> -> vector<8x512xf32>
    %c40 = arith.constant 40 : index
    %c0_36 = arith.constant 0 : index
    %69 = vector.load %arg6[%c40, %c0_36] : memref<72x512xf32, #tpu.memory_space<vmem>>, vector<8x512xf32>
    tpu.vector_store %arg6[%c40, %c0_36], %68 {strides = array<i32>} : memref<72x512xf32, #tpu.memory_space<vmem>>, vector<8x512xf32>,
    %c0_37 = arith.constant 0 : index
    %c143 = arith.constant 143 : index
    %70 = vector.load %arg5[%c0_37, %c143] : memref<4x768xf32, #tpu.memory_space<vmem>>, vector<4x512xf32>
    %71 = arith.andi %19, %21 : vector<1x512xi1>
    %cst_38 = arith.constant 0.000000e+00 : f32
    %72 = vector.shape_cast %71 : vector<1x512xi1> to vector<1x512xi1>
    %73 = vector.broadcast %72 : vector<1x512xi1> to vector<4x512xi1>
    %74 = vector.broadcast %cst_38 : f32 to vector<4x512xf32>
    %75 = arith.select %73, %70, %74 : vector<4x512xi1>, vector<4x512xf32>
    %cst_39 = arith.constant 0.000000e+00 : f32
    %76 = vector.broadcast %cst_39 : f32 to vector<4x512xf32>
    %77 = tpu.concatenate %75, %76 in 0 : vector<4x512xf32>, vector<4x512xf32> -> vector<8x512xf32>
    %c48 = arith.constant 48 : index
    %c0_40 = arith.constant 0 : index
    %78 = vector.load %arg6[%c48, %c0_40] : memref<72x512xf32, #tpu.memory_space<vmem>>, vector<8x512xf32>
    tpu.vector_store %arg6[%c48, %c0_40], %77 {strides = array<i32>} : memref<72x512xf32, #tpu.memory_space<vmem>>, vector<8x512xf32>,
    %c0_41 = arith.constant 0 : index
    %c144 = arith.constant 144 : index
    %79 = vector.load %arg5[%c0_41, %c144] : memref<4x768xf32, #tpu.memory_space<vmem>>, vector<4x512xf32>
    %cst_42 = arith.constant 0.000000e+00 : f32
    %80 = vector.shape_cast %19 : vector<1x512xi1> to vector<1x512xi1>
    %81 = vector.broadcast %80 : vector<1x512xi1> to vector<4x512xi1>
    %82 = vector.broadcast %cst_42 : f32 to vector<4x512xf32>
    %83 = arith.select %81, %79, %82 : vector<4x512xi1>, vector<4x512xf32>
    %cst_43 = arith.constant 0.000000e+00 : f32
    %84 = vector.broadcast %cst_43 : f32 to vector<4x512xf32>
    %85 = tpu.concatenate %83, %84 in 0 : vector<4x512xf32>, vector<4x512xf32> -> vector<8x512xf32>
    %c56 = arith.constant 56 : index
    %c0_44 = arith.constant 0 : index
    %86 = vector.load %arg6[%c56, %c0_44] : memref<72x512xf32, #tpu.memory_space<vmem>>, vector<8x512xf32>
    tpu.vector_store %arg6[%c56, %c0_44], %85 {strides = array<i32>} : memref<72x512xf32, #tpu.memory_space<vmem>>, vector<8x512xf32>,
    %c0_45 = arith.constant 0 : index
    %c145 = arith.constant 145 : index
    %87 = vector.load %arg5[%c0_45, %c145] : memref<4x768xf32, #tpu.memory_space<vmem>>, vector<4x512xf32>
    %88 = arith.andi %19, %23 : vector<1x512xi1>
    %cst_46 = arith.constant 0.000000e+00 : f32
    %89 = vector.shape_cast %88 : vector<1x512xi1> to vector<1x512xi1>
    %90 = vector.broadcast %89 : vector<1x512xi1> to vector<4x512xi1>
    %91 = vector.broadcast %cst_46 : f32 to vector<4x512xf32>
    %92 = arith.select %90, %87, %91 : vector<4x512xi1>, vector<4x512xf32>
    %cst_47 = arith.constant 0.000000e+00 : f32
    %93 = vector.broadcast %cst_47 : f32 to vector<4x512xf32>
    %94 = tpu.concatenate %92, %93 in 0 : vector<4x512xf32>, vector<4x512xf32> -> vector<8x512xf32>
    %c64 = arith.constant 64 : index
    %c0_48 = arith.constant 0 : index
    %95 = vector.load %arg6[%c64, %c0_48] : memref<72x512xf32, #tpu.memory_space<vmem>>, vector<8x512xf32>
    tpu.vector_store %arg6[%c64, %c0_48], %94 {strides = array<i32>} : memref<72x512xf32, #tpu.memory_space<vmem>>, vector<8x512xf32>,
    %c0_49 = arith.constant 0 : index
    %c0_50 = arith.constant 0 : index
    %96 = vector.load %arg6[%c0_49, %c0_50] : memref<72x512xf32, #tpu.memory_space<vmem>>, vector<72x512xf32>
    %cst_51 = arith.constant dense<0.000000e+00> : vector<4x512xf32>
    %97 = tpu.matmul %10, %96, %cst_51 {dimension_numbers = #tpu.dot_dimension_numbers<[1], [0], [0], [1], [0, 0, 1, 1], [], []>} : vector<4x72xf32>, vector<72x512xf32>, vector<4x512xf32> -> vector<4x512xf32>
    %98 = vector.extract_strided_slice %97 {offsets = [0, 0], sizes = [4, 256], strides = [1, 1]} : vector<4x512xf32> to vector<4x256xf32>
    %c0_52 = arith.constant 0 : index
    %c0_53 = arith.constant 0 : index
    %c0_54 = arith.constant 0 : index
    %99 = vector.load %arg3[%c0_52, %c0_53, %c0_54] : memref<2x4x256xf32, #tpu.memory_space<vmem>>, vector<1x4x256xf32>
    %100 = vector.shape_cast %99 : vector<1x4x256xf32> to vector<4x256xf32>
    %101 = vector.shape_cast %98 : vector<4x256xf32> to vector<1x4x256xf32>
    tpu.vector_store %arg3[%c0_52, %c0_53, %c0_54], %101 {strides = array<i32>} : memref<2x4x256xf32, #tpu.memory_space<vmem>>, vector<1x4x256xf32>,
    %102 = vector.extract_strided_slice %97 {offsets = [0, 256], sizes = [4, 256], strides = [1, 1]} : vector<4x512xf32> to vector<4x256xf32>
    %c1_55 = arith.constant 1 : index
    %c0_56 = arith.constant 0 : index
    %c0_57 = arith.constant 0 : index
    %103 = vector.load %arg3[%c1_55, %c0_56, %c0_57] : memref<2x4x256xf32, #tpu.memory_space<vmem>>, vector<1x4x256xf32>
    %104 = vector.shape_cast %103 : vector<1x4x256xf32> to vector<4x256xf32>
    %105 = vector.shape_cast %102 : vector<4x256xf32> to vector<1x4x256xf32>
    tpu.vector_store %arg3[%c1_55, %c0_56, %c0_57], %105 {strides = array<i32>} : memref<2x4x256xf32, #tpu.memory_space<vmem>>, vector<1x4x256xf32>,
    %cst_58 = arith.constant dense<0.000000e+00> : vector<4xf32>
    %106 = vector.multi_reduction <add>, %97, %cst_58 [1] : vector<4x512xf32> to vector<4xf32>
    %107 = vector.shape_cast %106 : vector<4xf32> to vector<4x1xf32>
    %c0_59 = arith.constant 0 : index
    %c0_60 = arith.constant 0 : index
    %c0_61 = arith.constant 0 : index
    %108 = vector.load %arg4[%c0_59, %c0_60, %c0_61] : memref<1x4x2xf32, #tpu.memory_space<vmem>>, vector<1x4x1xf32>
    %109 = vector.shape_cast %108 : vector<1x4x1xf32> to vector<4x1xf32>
    %110 = vector.shape_cast %107 : vector<4x1xf32> to vector<1x4x1xf32>
    tpu.vector_store %arg4[%c0_59, %c0_60, %c0_61], %110 {strides = array<i32>} : memref<1x4x2xf32, #tpu.memory_space<vmem>>, vector<1x4x1xf32>,
    %111 = arith.mulf %97, %97 : vector<4x512xf32>
    %cst_62 = arith.constant dense<0.000000e+00> : vector<4xf32>
    %112 = vector.multi_reduction <add>, %111, %cst_62 [1] : vector<4x512xf32> to vector<4xf32>
    %113 = vector.shape_cast %112 : vector<4xf32> to vector<4x1xf32>
    %c0_63 = arith.constant 0 : index
    %c0_64 = arith.constant 0 : index
    %c1_65 = arith.constant 1 : index
    %114 = vector.load %arg4[%c0_63, %c0_64, %c1_65] : memref<1x4x2xf32, #tpu.memory_space<vmem>>, vector<1x4x1xf32>
    %115 = vector.shape_cast %114 : vector<1x4x1xf32> to vector<4x1xf32>
    %116 = vector.shape_cast %113 : vector<4x1xf32> to vector<1x4x1xf32>
    tpu.vector_store %arg4[%c0_63, %c0_64, %c1_65], %116 {strides = array<i32>} : memref<1x4x2xf32, #tpu.memory_space<vmem>>, vector<1x4x1xf32>,
    return
  }
  func.func @transform_0(%arg0: i32) -> (i32, i32, i32) {
    %c0_i32 = arith.constant 0 : i32
    %c0_i32_0 = arith.constant 0 : i32
    %c0_i32_1 = arith.constant 0 : i32
    return %arg0, %c0_i32, %c0_i32_0 : i32, i32, i32
  }
  func.func @transform_1(%arg0: i32) -> (i32, i32) {
    %c0_i32 = arith.constant 0 : i32
    %c0_i32_0 = arith.constant 0 : i32
    %c0_i32_1 = arith.constant 0 : i32
    return %c0_i32, %c0_i32_0 : i32, i32
  }
  func.func @transform_2(%arg0: i32) -> (i32, i32, i32) {
    %c0_i32 = arith.constant 0 : i32
    %c0_i32_0 = arith.constant 0 : i32
    %c0_i32_1 = arith.constant 0 : i32
    return %arg0, %c0_i32, %c0_i32_0 : i32, i32, i32
  }
  func.func @transform_3(%arg0: i32) -> (i32, i32, i32) {
    %c0_i32 = arith.constant 0 : i32
    %c0_i32_0 = arith.constant 0 : i32
    %c0_i32_1 = arith.constant 0 : i32
    return %arg0, %c0_i32, %c0_i32_0 : i32, i32, i32
  }
}

module attributes {stable_mosaic.version = 11 : i64} {
  func.func @finish_kernel(%arg0: i32, %arg1: memref<2x4x256xf32, #tpu.memory_space<vmem>>, %arg2: memref<2x4x256xf32, #tpu.memory_space<vmem>>, %arg3: memref<1x4x2xf32, #tpu.memory_space<vmem>>, %arg4: memref<4x1xf32, #tpu.memory_space<vmem>>, %arg5: memref<4x1xf32, #tpu.memory_space<vmem>>, %arg6: memref<2x4x256xf32, #tpu.memory_space<vmem>>) attributes {dimension_semantics = [#tpu.dimension_semantics<parallel>], iteration_bounds = array<i64: 1>, scalar_prefetch = 0 : i64, scratch_operands = 0 : i64, tpu.core_type = #tpu.core_type<tc>, window_params = [{transform_indices = @transform_0, window_bounds = array<i64: 2, 4, 256>}, {transform_indices = @transform_1, window_bounds = array<i64: 2, 4, 256>}, {pipeline_mode = #tpu.pipeline_mode<synchronous>, transform_indices = @transform_2, window_bounds = array<i64: 1, 4, 2>}, {pipeline_mode = #tpu.pipeline_mode<synchronous>, transform_indices = @transform_3, window_bounds = array<i64: 4, 1>}, {pipeline_mode = #tpu.pipeline_mode<synchronous>, transform_indices = @transform_4, window_bounds = array<i64: 4, 1>}, {transform_indices = @transform_5, window_bounds = array<i64: 2, 4, 256>}]} {
    %c0 = arith.constant 0 : index
    %c0_0 = arith.constant 0 : index
    %c0_1 = arith.constant 0 : index
    %0 = vector.load %arg3[%c0, %c0_0, %c0_1] : memref<1x4x2xf32, #tpu.memory_space<vmem>>, vector<1x4x2xf32>
    %cst = arith.constant dense<0.000000e+00> : vector<4x2xf32>
    %1 = vector.multi_reduction <add>, %0, %cst [0] : vector<1x4x2xf32> to vector<4x2xf32>
    %2 = vector.extract_strided_slice %1 {offsets = [0, 0], sizes = [4, 1], strides = [1, 1]} : vector<4x2xf32> to vector<4x1xf32>
    %cst_2 = arith.constant 0.001953125 : f32
    %3 = vector.broadcast %cst_2 : f32 to vector<4x1xf32>
    %4 = arith.mulf %2, %3 : vector<4x1xf32>
    %5 = vector.extract_strided_slice %1 {offsets = [0, 1], sizes = [4, 1], strides = [1, 1]} : vector<4x2xf32> to vector<4x1xf32>
    %cst_3 = arith.constant 0.001953125 : f32
    %6 = vector.broadcast %cst_3 : f32 to vector<4x1xf32>
    %7 = arith.mulf %5, %6 : vector<4x1xf32>
    %8 = arith.mulf %4, %4 : vector<4x1xf32>
    %9 = arith.subf %7, %8 : vector<4x1xf32>
    %c0_4 = arith.constant 0 : index
    %c0_5 = arith.constant 0 : index
    %10 = vector.load %arg4[%c0_4, %c0_5] : memref<4x1xf32, #tpu.memory_space<vmem>>, vector<4x1xf32>
    %cst_6 = arith.constant 9.99999974E-6 : f32
    %11 = vector.broadcast %cst_6 : f32 to vector<4x1xf32>
    %12 = arith.addf %9, %11 : vector<4x1xf32>
    %13 = math.rsqrt %12 : vector<4x1xf32>
    %14 = arith.mulf %10, %13 : vector<4x1xf32>
    %c0_7 = arith.constant 0 : index
    %c0_8 = arith.constant 0 : index
    %15 = vector.load %arg5[%c0_7, %c0_8] : memref<4x1xf32, #tpu.memory_space<vmem>>, vector<4x1xf32>
    %16 = arith.mulf %4, %14 : vector<4x1xf32>
    %17 = arith.subf %15, %16 : vector<4x1xf32>
    %c0_9 = arith.constant 0 : index
    %c0_10 = arith.constant 0 : index
    %c0_11 = arith.constant 0 : index
    %18 = vector.load %arg1[%c0_9, %c0_10, %c0_11] : memref<2x4x256xf32, #tpu.memory_space<vmem>>, vector<2x4x256xf32>
    %19 = vector.shape_cast %14 : vector<4x1xf32> to vector<1x4x1xf32>
    %20 = vector.broadcast %19 : vector<1x4x1xf32> to vector<2x4x256xf32>
    %21 = arith.mulf %18, %20 : vector<2x4x256xf32>
    %22 = vector.shape_cast %17 : vector<4x1xf32> to vector<1x4x1xf32>
    %23 = vector.broadcast %22 : vector<1x4x1xf32> to vector<2x4x256xf32>
    %24 = arith.addf %21, %23 : vector<2x4x256xf32>
    %c0_12 = arith.constant 0 : index
    %c0_13 = arith.constant 0 : index
    %c0_14 = arith.constant 0 : index
    %25 = vector.load %arg2[%c0_12, %c0_13, %c0_14] : memref<2x4x256xf32, #tpu.memory_space<vmem>>, vector<2x4x256xf32>
    %26 = arith.addf %24, %25 : vector<2x4x256xf32>
    %cst_15 = arith.constant 0.000000e+00 : f32
    %27 = vector.broadcast %cst_15 : f32 to vector<2x4x256xf32>
    %28 = arith.maximumf %26, %27 : vector<2x4x256xf32>
    %c0_16 = arith.constant 0 : index
    %c0_17 = arith.constant 0 : index
    %c0_18 = arith.constant 0 : index
    %29 = vector.load %arg6[%c0_16, %c0_17, %c0_18] : memref<2x4x256xf32, #tpu.memory_space<vmem>>, vector<2x4x256xf32>
    tpu.vector_store %arg6[%c0_16, %c0_17, %c0_18], %28 {strides = array<i32>} : memref<2x4x256xf32, #tpu.memory_space<vmem>>, vector<2x4x256xf32>,
    return
  }
  func.func @transform_0(%arg0: i32) -> (i32, i32, i32) {
    %c0_i32 = arith.constant 0 : i32
    %c0_i32_0 = arith.constant 0 : i32
    %c0_i32_1 = arith.constant 0 : i32
    return %arg0, %c0_i32, %c0_i32_0 : i32, i32, i32
  }
  func.func @transform_1(%arg0: i32) -> (i32, i32, i32) {
    %c0_i32 = arith.constant 0 : i32
    %c0_i32_0 = arith.constant 0 : i32
    %c0_i32_1 = arith.constant 0 : i32
    return %arg0, %c0_i32, %c0_i32_0 : i32, i32, i32
  }
  func.func @transform_2(%arg0: i32) -> (i32, i32, i32) {
    %c0_i32 = arith.constant 0 : i32
    %c0_i32_0 = arith.constant 0 : i32
    %c0_i32_1 = arith.constant 0 : i32
    %c0_i32_2 = arith.constant 0 : i32
    return %c0_i32, %c0_i32_0, %c0_i32_1 : i32, i32, i32
  }
  func.func @transform_3(%arg0: i32) -> (i32, i32) {
    %c0_i32 = arith.constant 0 : i32
    %c0_i32_0 = arith.constant 0 : i32
    %c0_i32_1 = arith.constant 0 : i32
    return %c0_i32, %c0_i32_0 : i32, i32
  }
  func.func @transform_4(%arg0: i32) -> (i32, i32) {
    %c0_i32 = arith.constant 0 : i32
    %c0_i32_0 = arith.constant 0 : i32
    %c0_i32_1 = arith.constant 0 : i32
    return %c0_i32, %c0_i32_0 : i32, i32
  }
  func.func @transform_5(%arg0: i32) -> (i32, i32, i32) {
    %c0_i32 = arith.constant 0 : i32
    %c0_i32_0 = arith.constant 0 : i32
    %c0_i32_1 = arith.constant 0 : i32
    return %arg0, %c0_i32, %c0_i32_0 : i32, i32, i32
  }
}

module attributes {stable_mosaic.version = 11 : i64} {
  func.func @conv2_kernel(%arg0: i32, %arg1: memref<2x4x256xf32, #tpu.memory_space<vmem>>, %arg2: memref<1x4x2xf32, #tpu.memory_space<vmem>>, %arg3: memref<4x1xf32, #tpu.memory_space<vmem>>, %arg4: memref<4x1xf32, #tpu.memory_space<vmem>>, %arg5: memref<4x72xf32, #tpu.memory_space<vmem>>, %arg6: memref<2x4x256xf32, #tpu.memory_space<vmem>>, %arg7: memref<1x4x2xf32, #tpu.memory_space<vmem>>, %arg8: memref<4x768xf32, #tpu.memory_space<vmem>>, %arg9: memref<72x512xf32, #tpu.memory_space<vmem>>) attributes {dimension_semantics = [#tpu.dimension_semantics<parallel>], iteration_bounds = array<i64: 1>, scalar_prefetch = 0 : i64, scratch_operands = 2 : i64, tpu.core_type = #tpu.core_type<tc>, window_params = [{transform_indices = @transform_0, window_bounds = array<i64: 2, 4, 256>}, {pipeline_mode = #tpu.pipeline_mode<synchronous>, transform_indices = @transform_1, window_bounds = array<i64: 1, 4, 2>}, {pipeline_mode = #tpu.pipeline_mode<synchronous>, transform_indices = @transform_2, window_bounds = array<i64: 4, 1>}, {pipeline_mode = #tpu.pipeline_mode<synchronous>, transform_indices = @transform_3, window_bounds = array<i64: 4, 1>}, {pipeline_mode = #tpu.pipeline_mode<synchronous>, transform_indices = @transform_4, window_bounds = array<i64: 4, 72>}, {transform_indices = @transform_5, window_bounds = array<i64: 2, 4, 256>}, {transform_indices = @transform_6, window_bounds = array<i64: 1, 4, 2>}]} {
    %cst = arith.constant 0.000000e+00 : f32
    %0 = vector.broadcast %cst : f32 to vector<4x128xf32>
    %c0 = arith.constant 0 : index
    %c0_0 = arith.constant 0 : index
    %1 = vector.load %arg8[%c0, %c0_0] : memref<4x768xf32, #tpu.memory_space<vmem>>, vector<4x128xf32>
    tpu.vector_store %arg8[%c0, %c0_0], %0 {strides = array<i32>} : memref<4x768xf32, #tpu.memory_space<vmem>>, vector<4x128xf32>,
    %cst_1 = arith.constant 0.000000e+00 : f32
    %2 = vector.broadcast %cst_1 : f32 to vector<4x128xf32>
    %c0_2 = arith.constant 0 : index
    %c640 = arith.constant 640 : index
    %3 = vector.load %arg8[%c0_2, %c640] : memref<4x768xf32, #tpu.memory_space<vmem>>, vector<4x128xf32>
    tpu.vector_store %arg8[%c0_2, %c640], %2 {strides = array<i32>} : memref<4x768xf32, #tpu.memory_space<vmem>>, vector<4x128xf32>,
    %c0_3 = arith.constant 0 : index
    %c0_4 = arith.constant 0 : index
    %c0_5 = arith.constant 0 : index
    %4 = vector.load %arg2[%c0_3, %c0_4, %c0_5] : memref<1x4x2xf32, #tpu.memory_space<vmem>>, vector<1x4x2xf32>
    %cst_6 = arith.constant dense<0.000000e+00> : vector<4x2xf32>
    %5 = vector.multi_reduction <add>, %4, %cst_6 [0] : vector<1x4x2xf32> to vector<4x2xf32>
    %6 = vector.extract_strided_slice %5 {offsets = [0, 0], sizes = [4, 1], strides = [1, 1]} : vector<4x2xf32> to vector<4x1xf32>
    %cst_7 = arith.constant 0.001953125 : f32
    %7 = vector.broadcast %cst_7 : f32 to vector<4x1xf32>
    %8 = arith.mulf %6, %7 : vector<4x1xf32>
    %9 = vector.extract_strided_slice %5 {offsets = [0, 1], sizes = [4, 1], strides = [1, 1]} : vector<4x2xf32> to vector<4x1xf32>
    %cst_8 = arith.constant 0.001953125 : f32
    %10 = vector.broadcast %cst_8 : f32 to vector<4x1xf32>
    %11 = arith.mulf %9, %10 : vector<4x1xf32>
    %12 = arith.mulf %8, %8 : vector<4x1xf32>
    %13 = arith.subf %11, %12 : vector<4x1xf32>
    %c0_9 = arith.constant 0 : index
    %c0_10 = arith.constant 0 : index
    %14 = vector.load %arg3[%c0_9, %c0_10] : memref<4x1xf32, #tpu.memory_space<vmem>>, vector<4x1xf32>
    %cst_11 = arith.constant 9.99999974E-6 : f32
    %15 = vector.broadcast %cst_11 : f32 to vector<4x1xf32>
    %16 = arith.addf %13, %15 : vector<4x1xf32>
    %17 = math.rsqrt %16 : vector<4x1xf32>
    %18 = arith.mulf %14, %17 : vector<4x1xf32>
    %c0_12 = arith.constant 0 : index
    %c0_13 = arith.constant 0 : index
    %19 = vector.load %arg4[%c0_12, %c0_13] : memref<4x1xf32, #tpu.memory_space<vmem>>, vector<4x1xf32>
    %20 = arith.mulf %8, %18 : vector<4x1xf32>
    %21 = arith.subf %19, %20 : vector<4x1xf32>
    %c0_14 = arith.constant 0 : index
    %c0_15 = arith.constant 0 : index
    %c0_16 = arith.constant 0 : index
    %22 = vector.load %arg1[%c0_14, %c0_15, %c0_16] : memref<2x4x256xf32, #tpu.memory_space<vmem>>, vector<1x4x256xf32>
    %23 = vector.shape_cast %22 : vector<1x4x256xf32> to vector<4x256xf32>
    %24 = vector.broadcast %18 : vector<4x1xf32> to vector<4x256xf32>
    %25 = arith.mulf %23, %24 : vector<4x256xf32>
    %26 = vector.broadcast %21 : vector<4x1xf32> to vector<4x256xf32>
    %27 = arith.addf %25, %26 : vector<4x256xf32>
    %cst_17 = arith.constant 0.000000e+00 : f32
    %28 = vector.broadcast %cst_17 : f32 to vector<4x256xf32>
    %29 = arith.maximumf %27, %28 : vector<4x256xf32>
    %c0_18 = arith.constant 0 : index
    %c128 = arith.constant 128 : index
    %30 = vector.load %arg8[%c0_18, %c128] : memref<4x768xf32, #tpu.memory_space<vmem>>, vector<4x256xf32>
    tpu.vector_store %arg8[%c0_18, %c128], %29 {strides = array<i32>} : memref<4x768xf32, #tpu.memory_space<vmem>>, vector<4x256xf32>,
    %c1 = arith.constant 1 : index
    %c0_19 = arith.constant 0 : index
    %c0_20 = arith.constant 0 : index
    %31 = vector.load %arg1[%c1, %c0_19, %c0_20] : memref<2x4x256xf32, #tpu.memory_space<vmem>>, vector<1x4x256xf32>
    %32 = vector.shape_cast %31 : vector<1x4x256xf32> to vector<4x256xf32>
    %33 = vector.broadcast %18 : vector<4x1xf32> to vector<4x256xf32>
    %34 = arith.mulf %32, %33 : vector<4x256xf32>
    %35 = vector.broadcast %21 : vector<4x1xf32> to vector<4x256xf32>
    %36 = arith.addf %34, %35 : vector<4x256xf32>
    %cst_21 = arith.constant 0.000000e+00 : f32
    %37 = vector.broadcast %cst_21 : f32 to vector<4x256xf32>
    %38 = arith.maximumf %36, %37 : vector<4x256xf32>
    %c0_22 = arith.constant 0 : index
    %c384 = arith.constant 384 : index
    %39 = vector.load %arg8[%c0_22, %c384] : memref<4x768xf32, #tpu.memory_space<vmem>>, vector<4x256xf32>
    tpu.vector_store %arg8[%c0_22, %c384], %38 {strides = array<i32>} : memref<4x768xf32, #tpu.memory_space<vmem>>, vector<4x256xf32>,
    %c0_23 = arith.constant 0 : index
    %c0_24 = arith.constant 0 : index
    %40 = vector.load %arg5[%c0_23, %c0_24] : memref<4x72xf32, #tpu.memory_space<vmem>>, vector<4x72xf32>
    %41 = tpu.iota {dimensions = array<i32: 1>} : vector<1x512xi32>
    %c15_i32 = arith.constant 15 : i32
    %42 = vector.broadcast %c15_i32 : i32 to vector<1x512xi32>
    %43 = arith.andi %41, %42 : vector<1x512xi32>
    %c255_i32 = arith.constant 255 : i32
    %44 = vector.broadcast %c255_i32 : i32 to vector<1x512xi32>
    %45 = arith.andi %41, %44 : vector<1x512xi32>
    %c16_i32 = arith.constant 16 : i32
    %46 = vector.broadcast %c16_i32 : i32 to vector<1x512xi32>
    %47 = arith.cmpi sge, %45, %46 : vector<1x512xi32>
    %c240_i32 = arith.constant 240 : i32
    %48 = vector.broadcast %c240_i32 : i32 to vector<1x512xi32>
    %49 = arith.cmpi slt, %45, %48 : vector<1x512xi32>
    %c1_i32 = arith.constant 1 : i32
    %50 = vector.broadcast %c1_i32 : i32 to vector<1x512xi32>
    %51 = arith.cmpi sge, %43, %50 : vector<1x512xi32>
    %c14_i32 = arith.constant 14 : i32
    %52 = vector.broadcast %c14_i32 : i32 to vector<1x512xi32>
    %53 = arith.cmpi sle, %43, %52 : vector<1x512xi32>
    %c0_25 = arith.constant 0 : index
    %c111 = arith.constant 111 : index
    %54 = vector.load %arg8[%c0_25, %c111] : memref<4x768xf32, #tpu.memory_space<vmem>>, vector<4x512xf32>
    %55 = arith.andi %47, %51 : vector<1x512xi1>
    %cst_26 = arith.constant 0.000000e+00 : f32
    %56 = vector.shape_cast %55 : vector<1x512xi1> to vector<1x512xi1>
    %57 = vector.broadcast %56 : vector<1x512xi1> to vector<4x512xi1>
    %58 = vector.broadcast %cst_26 : f32 to vector<4x512xf32>
    %59 = arith.select %57, %54, %58 : vector<4x512xi1>, vector<4x512xf32>
    %cst_27 = arith.constant 0.000000e+00 : f32
    %60 = vector.broadcast %cst_27 : f32 to vector<4x512xf32>
    %61 = tpu.concatenate %59, %60 in 0 : vector<4x512xf32>, vector<4x512xf32> -> vector<8x512xf32>
    %c0_28 = arith.constant 0 : index
    %c0_29 = arith.constant 0 : index
    %62 = vector.load %arg9[%c0_28, %c0_29] : memref<72x512xf32, #tpu.memory_space<vmem>>, vector<8x512xf32>
    tpu.vector_store %arg9[%c0_28, %c0_29], %61 {strides = array<i32>} : memref<72x512xf32, #tpu.memory_space<vmem>>, vector<8x512xf32>,
    %c0_30 = arith.constant 0 : index
    %c112 = arith.constant 112 : index
    %63 = vector.load %arg8[%c0_30, %c112] : memref<4x768xf32, #tpu.memory_space<vmem>>, vector<4x512xf32>
    %cst_31 = arith.constant 0.000000e+00 : f32
    %64 = vector.shape_cast %47 : vector<1x512xi1> to vector<1x512xi1>
    %65 = vector.broadcast %64 : vector<1x512xi1> to vector<4x512xi1>
    %66 = vector.broadcast %cst_31 : f32 to vector<4x512xf32>
    %67 = arith.select %65, %63, %66 : vector<4x512xi1>, vector<4x512xf32>
    %cst_32 = arith.constant 0.000000e+00 : f32
    %68 = vector.broadcast %cst_32 : f32 to vector<4x512xf32>
    %69 = tpu.concatenate %67, %68 in 0 : vector<4x512xf32>, vector<4x512xf32> -> vector<8x512xf32>
    %c8 = arith.constant 8 : index
    %c0_33 = arith.constant 0 : index
    %70 = vector.load %arg9[%c8, %c0_33] : memref<72x512xf32, #tpu.memory_space<vmem>>, vector<8x512xf32>
    tpu.vector_store %arg9[%c8, %c0_33], %69 {strides = array<i32>} : memref<72x512xf32, #tpu.memory_space<vmem>>, vector<8x512xf32>,
    %c0_34 = arith.constant 0 : index
    %c113 = arith.constant 113 : index
    %71 = vector.load %arg8[%c0_34, %c113] : memref<4x768xf32, #tpu.memory_space<vmem>>, vector<4x512xf32>
    %72 = arith.andi %47, %53 : vector<1x512xi1>
    %cst_35 = arith.constant 0.000000e+00 : f32
    %73 = vector.shape_cast %72 : vector<1x512xi1> to vector<1x512xi1>
    %74 = vector.broadcast %73 : vector<1x512xi1> to vector<4x512xi1>
    %75 = vector.broadcast %cst_35 : f32 to vector<4x512xf32>
    %76 = arith.select %74, %71, %75 : vector<4x512xi1>, vector<4x512xf32>
    %cst_36 = arith.constant 0.000000e+00 : f32
    %77 = vector.broadcast %cst_36 : f32 to vector<4x512xf32>
    %78 = tpu.concatenate %76, %77 in 0 : vector<4x512xf32>, vector<4x512xf32> -> vector<8x512xf32>
    %c16 = arith.constant 16 : index
    %c0_37 = arith.constant 0 : index
    %79 = vector.load %arg9[%c16, %c0_37] : memref<72x512xf32, #tpu.memory_space<vmem>>, vector<8x512xf32>
    tpu.vector_store %arg9[%c16, %c0_37], %78 {strides = array<i32>} : memref<72x512xf32, #tpu.memory_space<vmem>>, vector<8x512xf32>,
    %c0_38 = arith.constant 0 : index
    %c127 = arith.constant 127 : index
    %80 = vector.load %arg8[%c0_38, %c127] : memref<4x768xf32, #tpu.memory_space<vmem>>, vector<4x512xf32>
    %cst_39 = arith.constant 0.000000e+00 : f32
    %81 = vector.shape_cast %51 : vector<1x512xi1> to vector<1x512xi1>
    %82 = vector.broadcast %81 : vector<1x512xi1> to vector<4x512xi1>
    %83 = vector.broadcast %cst_39 : f32 to vector<4x512xf32>
    %84 = arith.select %82, %80, %83 : vector<4x512xi1>, vector<4x512xf32>
    %cst_40 = arith.constant 0.000000e+00 : f32
    %85 = vector.broadcast %cst_40 : f32 to vector<4x512xf32>
    %86 = tpu.concatenate %84, %85 in 0 : vector<4x512xf32>, vector<4x512xf32> -> vector<8x512xf32>
    %c24 = arith.constant 24 : index
    %c0_41 = arith.constant 0 : index
    %87 = vector.load %arg9[%c24, %c0_41] : memref<72x512xf32, #tpu.memory_space<vmem>>, vector<8x512xf32>
    tpu.vector_store %arg9[%c24, %c0_41], %86 {strides = array<i32>} : memref<72x512xf32, #tpu.memory_space<vmem>>, vector<8x512xf32>,
    %c0_42 = arith.constant 0 : index
    %c128_43 = arith.constant 128 : index
    %88 = vector.load %arg8[%c0_42, %c128_43] : memref<4x768xf32, #tpu.memory_space<vmem>>, vector<4x512xf32>
    %cst_44 = arith.constant 0.000000e+00 : f32
    %89 = vector.broadcast %cst_44 : f32 to vector<4x512xf32>
    %90 = tpu.concatenate %88, %89 in 0 : vector<4x512xf32>, vector<4x512xf32> -> vector<8x512xf32>
    %c32 = arith.constant 32 : index
    %c0_45 = arith.constant 0 : index
    %91 = vector.load %arg9[%c32, %c0_45] : memref<72x512xf32, #tpu.memory_space<vmem>>, vector<8x512xf32>
    tpu.vector_store %arg9[%c32, %c0_45], %90 {strides = array<i32>} : memref<72x512xf32, #tpu.memory_space<vmem>>, vector<8x512xf32>,
    %c0_46 = arith.constant 0 : index
    %c129 = arith.constant 129 : index
    %92 = vector.load %arg8[%c0_46, %c129] : memref<4x768xf32, #tpu.memory_space<vmem>>, vector<4x512xf32>
    %cst_47 = arith.constant 0.000000e+00 : f32
    %93 = vector.shape_cast %53 : vector<1x512xi1> to vector<1x512xi1>
    %94 = vector.broadcast %93 : vector<1x512xi1> to vector<4x512xi1>
    %95 = vector.broadcast %cst_47 : f32 to vector<4x512xf32>
    %96 = arith.select %94, %92, %95 : vector<4x512xi1>, vector<4x512xf32>
    %cst_48 = arith.constant 0.000000e+00 : f32
    %97 = vector.broadcast %cst_48 : f32 to vector<4x512xf32>
    %98 = tpu.concatenate %96, %97 in 0 : vector<4x512xf32>, vector<4x512xf32> -> vector<8x512xf32>
    %c40 = arith.constant 40 : index
    %c0_49 = arith.constant 0 : index
    %99 = vector.load %arg9[%c40, %c0_49] : memref<72x512xf32, #tpu.memory_space<vmem>>, vector<8x512xf32>
    tpu.vector_store %arg9[%c40, %c0_49], %98 {strides = array<i32>} : memref<72x512xf32, #tpu.memory_space<vmem>>, vector<8x512xf32>,
    %c0_50 = arith.constant 0 : index
    %c143 = arith.constant 143 : index
    %100 = vector.load %arg8[%c0_50, %c143] : memref<4x768xf32, #tpu.memory_space<vmem>>, vector<4x512xf32>
    %101 = arith.andi %49, %51 : vector<1x512xi1>
    %cst_51 = arith.constant 0.000000e+00 : f32
    %102 = vector.shape_cast %101 : vector<1x512xi1> to vector<1x512xi1>
    %103 = vector.broadcast %102 : vector<1x512xi1> to vector<4x512xi1>
    %104 = vector.broadcast %cst_51 : f32 to vector<4x512xf32>
    %105 = arith.select %103, %100, %104 : vector<4x512xi1>, vector<4x512xf32>
    %cst_52 = arith.constant 0.000000e+00 : f32
    %106 = vector.broadcast %cst_52 : f32 to vector<4x512xf32>
    %107 = tpu.concatenate %105, %106 in 0 : vector<4x512xf32>, vector<4x512xf32> -> vector<8x512xf32>
    %c48 = arith.constant 48 : index
    %c0_53 = arith.constant 0 : index
    %108 = vector.load %arg9[%c48, %c0_53] : memref<72x512xf32, #tpu.memory_space<vmem>>, vector<8x512xf32>
    tpu.vector_store %arg9[%c48, %c0_53], %107 {strides = array<i32>} : memref<72x512xf32, #tpu.memory_space<vmem>>, vector<8x512xf32>,
    %c0_54 = arith.constant 0 : index
    %c144 = arith.constant 144 : index
    %109 = vector.load %arg8[%c0_54, %c144] : memref<4x768xf32, #tpu.memory_space<vmem>>, vector<4x512xf32>
    %cst_55 = arith.constant 0.000000e+00 : f32
    %110 = vector.shape_cast %49 : vector<1x512xi1> to vector<1x512xi1>
    %111 = vector.broadcast %110 : vector<1x512xi1> to vector<4x512xi1>
    %112 = vector.broadcast %cst_55 : f32 to vector<4x512xf32>
    %113 = arith.select %111, %109, %112 : vector<4x512xi1>, vector<4x512xf32>
    %cst_56 = arith.constant 0.000000e+00 : f32
    %114 = vector.broadcast %cst_56 : f32 to vector<4x512xf32>
    %115 = tpu.concatenate %113, %114 in 0 : vector<4x512xf32>, vector<4x512xf32> -> vector<8x512xf32>
    %c56 = arith.constant 56 : index
    %c0_57 = arith.constant 0 : index
    %116 = vector.load %arg9[%c56, %c0_57] : memref<72x512xf32, #tpu.memory_space<vmem>>, vector<8x512xf32>
    tpu.vector_store %arg9[%c56, %c0_57], %115 {strides = array<i32>} : memref<72x512xf32, #tpu.memory_space<vmem>>, vector<8x512xf32>,
    %c0_58 = arith.constant 0 : index
    %c145 = arith.constant 145 : index
    %117 = vector.load %arg8[%c0_58, %c145] : memref<4x768xf32, #tpu.memory_space<vmem>>, vector<4x512xf32>
    %118 = arith.andi %49, %53 : vector<1x512xi1>
    %cst_59 = arith.constant 0.000000e+00 : f32
    %119 = vector.shape_cast %118 : vector<1x512xi1> to vector<1x512xi1>
    %120 = vector.broadcast %119 : vector<1x512xi1> to vector<4x512xi1>
    %121 = vector.broadcast %cst_59 : f32 to vector<4x512xf32>
    %122 = arith.select %120, %117, %121 : vector<4x512xi1>, vector<4x512xf32>
    %cst_60 = arith.constant 0.000000e+00 : f32
    %123 = vector.broadcast %cst_60 : f32 to vector<4x512xf32>
    %124 = tpu.concatenate %122, %123 in 0 : vector<4x512xf32>, vector<4x512xf32> -> vector<8x512xf32>
    %c64 = arith.constant 64 : index
    %c0_61 = arith.constant 0 : index
    %125 = vector.load %arg9[%c64, %c0_61] : memref<72x512xf32, #tpu.memory_space<vmem>>, vector<8x512xf32>
    tpu.vector_store %arg9[%c64, %c0_61], %124 {strides = array<i32>} : memref<72x512xf32, #tpu.memory_space<vmem>>, vector<8x512xf32>,
    %c0_62 = arith.constant 0 : index
    %c0_63 = arith.constant 0 : index
    %126 = vector.load %arg9[%c0_62, %c0_63] : memref<72x512xf32, #tpu.memory_space<vmem>>, vector<72x512xf32>
    %cst_64 = arith.constant dense<0.000000e+00> : vector<4x512xf32>
    %127 = tpu.matmul %40, %126, %cst_64 {dimension_numbers = #tpu.dot_dimension_numbers<[1], [0], [0], [1], [0, 0, 1, 1], [], []>} : vector<4x72xf32>, vector<72x512xf32>, vector<4x512xf32> -> vector<4x512xf32>
    %128 = vector.extract_strided_slice %127 {offsets = [0, 0], sizes = [4, 256], strides = [1, 1]} : vector<4x512xf32> to vector<4x256xf32>
    %c0_65 = arith.constant 0 : index
    %c0_66 = arith.constant 0 : index
    %c0_67 = arith.constant 0 : index
    %129 = vector.load %arg6[%c0_65, %c0_66, %c0_67] : memref<2x4x256xf32, #tpu.memory_space<vmem>>, vector<1x4x256xf32>
    %130 = vector.shape_cast %129 : vector<1x4x256xf32> to vector<4x256xf32>
    %131 = vector.shape_cast %128 : vector<4x256xf32> to vector<1x4x256xf32>
    tpu.vector_store %arg6[%c0_65, %c0_66, %c0_67], %131 {strides = array<i32>} : memref<2x4x256xf32, #tpu.memory_space<vmem>>, vector<1x4x256xf32>,
    %132 = vector.extract_strided_slice %127 {offsets = [0, 256], sizes = [4, 256], strides = [1, 1]} : vector<4x512xf32> to vector<4x256xf32>
    %c1_68 = arith.constant 1 : index
    %c0_69 = arith.constant 0 : index
    %c0_70 = arith.constant 0 : index
    %133 = vector.load %arg6[%c1_68, %c0_69, %c0_70] : memref<2x4x256xf32, #tpu.memory_space<vmem>>, vector<1x4x256xf32>
    %134 = vector.shape_cast %133 : vector<1x4x256xf32> to vector<4x256xf32>
    %135 = vector.shape_cast %132 : vector<4x256xf32> to vector<1x4x256xf32>
    tpu.vector_store %arg6[%c1_68, %c0_69, %c0_70], %135 {strides = array<i32>} : memref<2x4x256xf32, #tpu.memory_space<vmem>>, vector<1x4x256xf32>,
    %cst_71 = arith.constant dense<0.000000e+00> : vector<4xf32>
    %136 = vector.multi_reduction <add>, %127, %cst_71 [1] : vector<4x512xf32> to vector<4xf32>
    %137 = vector.shape_cast %136 : vector<4xf32> to vector<4x1xf32>
    %c0_72 = arith.constant 0 : index
    %c0_73 = arith.constant 0 : index
    %c0_74 = arith.constant 0 : index
    %138 = vector.load %arg7[%c0_72, %c0_73, %c0_74] : memref<1x4x2xf32, #tpu.memory_space<vmem>>, vector<1x4x1xf32>
    %139 = vector.shape_cast %138 : vector<1x4x1xf32> to vector<4x1xf32>
    %140 = vector.shape_cast %137 : vector<4x1xf32> to vector<1x4x1xf32>
    tpu.vector_store %arg7[%c0_72, %c0_73, %c0_74], %140 {strides = array<i32>} : memref<1x4x2xf32, #tpu.memory_space<vmem>>, vector<1x4x1xf32>,
    %141 = arith.mulf %127, %127 : vector<4x512xf32>
    %cst_75 = arith.constant dense<0.000000e+00> : vector<4xf32>
    %142 = vector.multi_reduction <add>, %141, %cst_75 [1] : vector<4x512xf32> to vector<4xf32>
    %143 = vector.shape_cast %142 : vector<4xf32> to vector<4x1xf32>
    %c0_76 = arith.constant 0 : index
    %c0_77 = arith.constant 0 : index
    %c1_78 = arith.constant 1 : index
    %144 = vector.load %arg7[%c0_76, %c0_77, %c1_78] : memref<1x4x2xf32, #tpu.memory_space<vmem>>, vector<1x4x1xf32>
    %145 = vector.shape_cast %144 : vector<1x4x1xf32> to vector<4x1xf32>
    %146 = vector.shape_cast %143 : vector<4x1xf32> to vector<1x4x1xf32>
    tpu.vector_store %arg7[%c0_76, %c0_77, %c1_78], %146 {strides = array<i32>} : memref<1x4x2xf32, #tpu.memory_space<vmem>>, vector<1x4x1xf32>,
    return
  }
  func.func @transform_0(%arg0: i32) -> (i32, i32, i32) {
    %c0_i32 = arith.constant 0 : i32
    %c0_i32_0 = arith.constant 0 : i32
    %c0_i32_1 = arith.constant 0 : i32
    return %arg0, %c0_i32, %c0_i32_0 : i32, i32, i32
  }
  func.func @transform_1(%arg0: i32) -> (i32, i32, i32) {
    %c0_i32 = arith.constant 0 : i32
    %c0_i32_0 = arith.constant 0 : i32
    %c0_i32_1 = arith.constant 0 : i32
    %c0_i32_2 = arith.constant 0 : i32
    return %c0_i32, %c0_i32_0, %c0_i32_1 : i32, i32, i32
  }
  func.func @transform_2(%arg0: i32) -> (i32, i32) {
    %c0_i32 = arith.constant 0 : i32
    %c0_i32_0 = arith.constant 0 : i32
    %c0_i32_1 = arith.constant 0 : i32
    return %c0_i32, %c0_i32_0 : i32, i32
  }
  func.func @transform_3(%arg0: i32) -> (i32, i32) {
    %c0_i32 = arith.constant 0 : i32
    %c0_i32_0 = arith.constant 0 : i32
    %c0_i32_1 = arith.constant 0 : i32
    return %c0_i32, %c0_i32_0 : i32, i32
  }
  func.func @transform_4(%arg0: i32) -> (i32, i32) {
    %c0_i32 = arith.constant 0 : i32
    %c0_i32_0 = arith.constant 0 : i32
    %c0_i32_1 = arith.constant 0 : i32
    return %c0_i32, %c0_i32_0 : i32, i32
  }
  func.func @transform_5(%arg0: i32) -> (i32, i32, i32) {
    %c0_i32 = arith.constant 0 : i32
    %c0_i32_0 = arith.constant 0 : i32
    %c0_i32_1 = arith.constant 0 : i32
    return %arg0, %c0_i32, %c0_i32_0 : i32, i32, i32
  }
  func.func @transform_6(%arg0: i32) -> (i32, i32, i32) {
    %c0_i32 = arith.constant 0 : i32
    %c0_i32_0 = arith.constant 0 : i32
    %c0_i32_1 = arith.constant 0 : i32
    return %arg0, %c0_i32, %c0_i32_0 : i32, i32, i32
  }
}

</mosaic_0001>

<bundles_post_ra>
// kernel: resblock_forward.5
= control target key start
LH: loop header
LB: loop body
LE: loop exit
PB: predicated region body
PF: predicated region fallthrough
CT: control target
= control target key end

     0   :  { %s90_s20 = smov 1   ;;  %v91_v6 = vmov 0   ;;  %s92_s21 = smov 127   ;;  %v93_v14 = vmov 839922192   ;;  %v49_v16 = vlaneseq  ;;  %s151_s2 = inlined_call_operand.vmem [shape: f32[1,4,2], index: 2, kind: input, shape index: {}]   ;;  %s152_s3 = inlined_call_operand.vmem [shape: f32[4,1], index: 3, kind: input, shape index: {}]   ;;  %s153_s4 = inlined_call_operand.vmem [shape: f32[4,1], index: 4, kind: input, shape index: {}]   ;;  %s154_s0 = inlined_call_operand.vmem [shape: f32[2,4,256], index: 0, kind: input, shape index: {}, may-alias: {0,5}]   ;;  %s155_s1 = inlined_call_operand.vmem [shape: f32[2,4,256], index: 1, kind: input, shape index: {}]   ;;  %s156_s5 = inlined_call_operand.vmem [shape: f32[2,4,256], index: 5, kind: output, shape index: {}, may-alias: {0,5}]  }
   0x1   :  { %v20_v0 = vld [vmem:[%s151_s2] sm:$0xf]  ;;  %86 = vset.pattern.permute.xlu1 %v91_v6  ;;  %87 = vset.pattern.permute.xlu0 %v91_v6  ;;  %v47_v15 = vunpack.c.l.s4 %v93_v14  ;;  %v41_v23 = vld [vmem:[%s154_s0 + $0x8] sm:$0xff] }
   0x2   :  { %v22_v1 = vmul.f32 0.001953125, %v20_v0  ;;  %v29_v8 = vld [vmem:[%s152_s3] sm:$0xf]  ;;  %v50_v18 = vshrl.u32 %v49_v16, 7  ;;  %v71_v29 = vld [vmem:[%s155_s1 + $0x8] sm:$0xff] }
   0x3   :  { %v37_v11 = vld [vmem:[%s153_s4] sm:$0xf]  ;;  %v48_v17 = vunpack.c.0.s8 %v47_v15 }
   0x4   :  { %v23_v2 = vmul.f32 %v22_v1, %v22_v1  ;;  %v40_v22 = vld [vmem:[%s154_s0] sm:$0xff] }
   0x5   :  { %v51_v19 = vsub.s32 %v48_v17, %v50_v18  ;;  %v70_v28 = vld [vmem:[%s155_s1] sm:$0xff] }
   0x6   :  { %25 = vrot.lane.b32.xlu0 %v23_v2, %s90_s20 }
  0x78   :  { %v26_v3 = vpop.permute.xlu0 %25 }
  0x79   :  { %v28_v4 = vsub.f32 %v22_v1, %v26_v3 }
  0x7b   :  { %v30_v5 = vadd.f32 1e-05, %v28_v4 }
  0x7d   :  { %88 = vrsqrt.f32 %v30_v5 }
  0x8a   :  { %v89_v7 = vpop.eup %88 }
  0x8b   :  { %33 = vrot.lane.b32.xlu0 %v89_v7, %s92_s21 }
  0xfd   :  { %v34_v9 = vpop.permute.xlu0 %33 }
  0xfe   :  { %v36_v10 = vmul.f32 %v34_v9, %v29_v8 }
 0x100   :  { %v38_v12 = vmul.f32 %v36_v10, %v22_v1  ;;  %44 = vperm.xlu1 %86, %v36_v10  }
 0x102   :  { %v39_v13 = vsub.f32 %v37_v11, %v38_v12 }
 0x104   :  { %58 = vperm.xlu1 %86, %v39_v13  }
 0x17b   :  { %v45_v20 = vpop.permute.xlu1 %44 }
 0x17c   :  { %v52_v21 = vrot.slane %v45_v20, %v51_v19 }
 0x17e   :  { %v54_v25 = vmul.f32 %v52_v21, %v40_v22  ;;  %v55_v26 = vmul.f32 %v52_v21, %v41_v23 }
 0x17f   :  { %v59_v24 = vpop.permute.xlu1 %58 }
 0x180   :  { %v66_v27 = vrot.slane %v59_v24, %v51_v19 }
 0x182   :  { %v68_v30 = vadd.f32 %v66_v27, %v54_v25  ;;  %v69_v31 = vadd.f32 %v66_v27, %v55_v26 }
 0x184   :  { %v72_v32 = vadd.f32 %v70_v28, %v68_v30  ;;  %v73_v33 = vadd.f32 %v71_v29, %v69_v31 }
 0x186   :  { %v74_v34 = vmax.f32 %v72_v32, 0.0  ;;  %v75_v35 = vmax.f32 %v73_v33, 0.0 }
 0x188   :  { %76 = vst [vmem:[%s156_s5] sm:$0xff] %v74_v34  ;;  %77 = vst [vmem:[%s156_s5 + $0x8] sm:$0xff] %v75_v35 }

// kernel: resblock_forward.3
= control target key start
LH: loop header
LB: loop body
LE: loop exit
PB: predicated region body
PF: predicated region fallthrough
CT: control target
= control target key end

     0   :  { %v739_v2 = vmov 0.0   ;;  %s740_s16 = smov 111   ;;  %s742_s17 = smov 113   ;;  %v21_v17 = vlaneseq  ;;  %vm387_vm2 = vcmask 916480   ;;  %vm438_vm3 = vcmask 908288   ;;  %s1040_s0 = inlined_call_operand.vmem [shape: f32[2,4,256], index: 0, kind: input, shape index: {}]   ;;  %s1041_s1 = inlined_call_operand.vmem [shape: f32[4,72], index: 1, kind: input, shape index: {}]   ;;  %s1042_s2 = inlined_call_operand.vmem [shape: f32[2,4,256], index: 2, kind: output, shape index: {0}]   ;;  %s1043_s3 = inlined_call_operand.vmem [shape: f32[1,4,2], index: 3, kind: output, shape index: {1}]  }
   0x1   :  { %v771_v0 = vld [vmem:[%s1040_s0 + $0x8] sm:$0xff]  ;;  %v776_v1 = vld [vmem:[%s1040_s0] sm:$0xff]  ;;  %14 = vst [vmem:[#allocation2 + $0x14] sm:$0xf] %v739_v2  ;;  %13 = vst [vmem:[#allocation2] sm:$0xf] %v739_v2  ;;  %563 = vmatprep.mubr.f32.mxu0 %v739_v2  ;;  %634 = vmatprep.mubr.f32.mxu1 %v739_v2 }
   0x2   :  { %19 = vst [vmem:[#allocation2 + $0xc] sm:$0xff] %v771_v0  ;;  %432 = vrot.lane.b32.xlu0 %v771_v0, %s740_s16  ;;  %16 = vst [vmem:[#allocation2 + $0x4] sm:$0xff] %v776_v1  ;;  %428 = vrot.lane.b32.xlu1 %v776_v1, %s740_s16  ;;  %v784_v3 = vcombine.high %v776_v1, %v776_v1  ;;  %s741_s0 = smov 112   ;;  %v792_v4 = vcombine.high %v771_v0, %v771_v0  ;;  %s743_s18 = smov 127   ;;  %v804_v18 = vand.u32 127, %v21_v17  ;;  %vm340_vm7 = vcmask 924672  }
   0x3   :  { %s744_s19 = smov 1   ;;  %s745_s20 = smov 15   ;;  %vm93_vm8 = vcmask 1043456   ;;  %vm289_vm15 = vcmask 1039360   ;;  %v20_v58 = vld [vmem:[%s1041_s1] sm:$0xf] }
   0x4   :  { %s746_s21 = smov 16   ;;  %s747_s22 = smov 17   ;;  %v23_v21 = vadd.s32 128, %v804_v18  ;;  %v25_v25 = vadd.s32 384, %v804_v18  ;;  %v26_v27 = vand.u32 15, %v804_v18  ;;  %v812_v28 = vadd.s32 256, %v804_v18 }
   0x6   :  { %381 = vrot.lane.b32.xlu0 %v771_v0, %s741_s0  ;;  %377 = vrot.lane.b32.xlu1 %v776_v1, %s741_s0  ;;  %v27_v24 = vand.u32 15, %v23_v21  ;;  %v31_v26 = vand.u32 255, %v23_v21  ;;  %v29_v32 = vand.u32 15, %v25_v25  ;;  %v33_v33 = vand.u32 255, %v25_v25 }
   0x7   :  { %vm832_vm6 = vcmp.le.s32.totalorder %v26_v27, 14  ;;  %v28_v37 = vand.u32 15, %v812_v28  ;;  %vm878_vm14 = vcmp.ge.s32.totalorder %v26_v27, 1  ;;  %v30_v27 = vand.u32 255, %v804_v18 }
   0x8   :  { %v410_v5 = vld [vmem:[#allocation2 + $0x14] sm:$0xf]  ;;  %vm816_vm0 = vcmp.le.s32.totalorder %v27_v24, 14  ;;  %vm820_vm1 = vcmp.lt.s32.totalorder %v31_v26, 240  ;;  %vm824_vm4 = vcmp.ge.s32.totalorder %v27_v24, 1  ;;  %vm837_vm9 = vcmp.lt.s32.totalorder %v33_v33, 240 }
   0x9   :  { %v363_v6 = vld [vmem:[#allocation2 + $0x14] sm:$0xf]  ;;  %v200_v8 = vld [vmem:[#allocation2] sm:$0xff]  ;;  %v201_v10 = vld [vmem:[#allocation2 + $0x8] sm:$0xff]  ;;  %vm841_vm10 = vcmp.le.s32.totalorder %v29_v32, 14  ;;  %vm862_vm13 = vcmp.le.s32.totalorder %v28_v37, 14 }
   0xa   :  { %334 = vrot.lane.b32.xlu0 %v771_v0, %s742_s17  ;;  %379 = vrot.lane.b32.xlu1 %v784_v3, %s741_s0  ;;  %v312_v7 = vld [vmem:[#allocation2 + $0x14] sm:$0xf]  ;;  %v214_v9 = vcombine.high %v200_v8, %v200_v8  ;;  %v215_v12 = vcombine.high %v201_v10, %v201_v10  ;;  %v202_v13 = vld [vmem:[#allocation2 + $0x10] sm:$0xf]  ;;  %vm412_vm5 = vmand %vm820_vm1, %vm816_vm0 }
   0xb   :  { %v265_v11 = vld [vmem:[#allocation2 + $0x14] sm:$0xf]  ;;  %v151_v14 = vld [vmem:[#allocation2 + $0x10] sm:$0xf]  ;;  %vm314_vm11 = vmand %vm820_vm1, %vm824_vm4 }
   0xc   :  { %v104_v15 = vld [vmem:[#allocation2 + $0x10] sm:$0xf]  ;;  %vm414_vm12 = vmand %vm837_vm9, %vm841_vm10 }
   0xd   :  { %v52_v16 = vld [vmem:[#allocation2 + $0x10] sm:$0xf] }
   0xe   :  { %430 = vrot.lane.b32.xlu0 %v784_v3, %s740_s16  ;;  %332 = vrot.lane.b32.xlu1 %v784_v3, %s742_s17 }
  0x12   :  { %434 = vrot.lane.b32.xlu0 %v792_v4, %s740_s16  ;;  %436 = vrot.lane.b32.xlu1 %v410_v5, %s740_s16 }
  0x16   :  { %330 = vrot.lane.b32.xlu0 %v776_v1, %s742_s17  ;;  %281 = vrot.lane.b32.xlu1 %v784_v3, %s743_s18 }
  0x1a   :  { %283 = vrot.lane.b32.xlu0 %v771_v0, %s743_s18  ;;  %383 = vrot.lane.b32.xlu1 %v792_v4, %s741_s0 }
  0x1e   :  { %385 = vrot.lane.b32.xlu0 %v363_v6, %s741_s0  ;;  %279 = vrot.lane.b32.xlu1 %v776_v1, %s743_s18 }
  0x22   :  { %336 = vrot.lane.b32.xlu0 %v792_v4, %s742_s17  ;;  %338 = vrot.lane.b32.xlu1 %v312_v7, %s742_s17 }
  0x26   :  { %220 = vrot.lane.b32.xlu1 %v201_v10, %s744_s19  ;;  %218 = vrot.lane.b32.xlu0 %v214_v9, %s744_s19 }
  0x2a   :  { %287 = vrot.lane.b32.xlu1 %v265_v11, %s743_s18  ;;  %285 = vrot.lane.b32.xlu0 %v792_v4, %s743_s18 }
  0x2e   :  { %216 = vrot.lane.b32.xlu0 %v200_v8, %s744_s19  ;;  %171 = vrot.lane.b32.xlu1 %v214_v9, %s745_s20 }
  0x32   :  { %173 = vrot.lane.b32.xlu0 %v201_v10, %s745_s20  ;;  %169 = vrot.lane.b32.xlu1 %v200_v8, %s745_s20 }
  0x36   :  { %222 = vrot.lane.b32.xlu0 %v215_v12, %s744_s19  ;;  %224 = vrot.lane.b32.xlu1 %v202_v13, %s744_s19 }
  0x3a   :  { %118 = vrot.lane.b32.xlu0 %v200_v8, %s746_s21  ;;  %120 = vrot.lane.b32.xlu1 %v214_v9, %s746_s21 }
  0x3e   :  { %122 = vrot.lane.b32.xlu0 %v201_v10, %s746_s21  ;;  %72 = vrot.lane.b32.xlu1 %v214_v9, %s747_s22 }
  0x42   :  { %74 = vrot.lane.b32.xlu0 %v201_v10, %s747_s22  ;;  %175 = vrot.lane.b32.xlu1 %v215_v12, %s745_s20 }
  0x46   :  { %177 = vrot.lane.b32.xlu0 %v151_v14, %s745_s20  ;;  %70 = vrot.lane.b32.xlu1 %v200_v8, %s747_s22 }
  0x4a   :  { %124 = vrot.lane.b32.xlu0 %v215_v12, %s746_s21  ;;  %126 = vrot.lane.b32.xlu1 %v104_v15, %s746_s21 }
  0x4e   :  { %76 = vrot.lane.b32.xlu0 %v215_v12, %s747_s22  ;;  %78 = vrot.lane.b32.xlu1 %v52_v16, %s747_s22 }
  0x74   :  { %v433_v19 = vpop.permute.xlu0 %432  ;;  %v429_v20 = vpop.permute.xlu1 %428 }
  0x78   :  { %v807_v22 = vpop.permute.xlu0 %381  ;;  %v378_v23 = vpop.permute.xlu1 %377 }
  0x7c   :  { %v814_v29 = vpop.permute.xlu0 %334  ;;  %v380_v30 = vpop.permute.xlu1 %379 }
  0x7d   :  { %v389_v42 = vsel %vm387_vm2, %v380_v30, %v807_v22  ;;  %v388_v52 = vsel %vm387_vm2, %v378_v23, %v380_v30 }
  0x7e   :  { %v397_v49 = vsel %vm820_vm1, %v389_v42, 0.0  ;;  %vm891_vm1 = vcmp.ge.s32.totalorder %v29_v32, 1 }
  0x80   :  { %v431_v38 = vpop.permute.xlu0 %430  ;;  %v333_v39 = vpop.permute.xlu1 %332 }
  0x81   :  { %v439_v43 = vsel %vm438_vm3, %v429_v20, %v431_v38  ;;  %v440_v44 = vsel %vm438_vm3, %v431_v38, %v433_v19  ;;  %v342_v47 = vsel %vm340_vm7, %v333_v39, %v814_v29 }
  0x82   :  { %v448_v45 = vsel %vm412_vm5, %v440_v44, 0.0  ;;  %v447_v46 = vsel %vm832_vm6, %v439_v43, 0.0  ;;  %v350_v55 = vsel %vm314_vm11, %v342_v47, 0.0  ;;  %vm316_vm5 = vmand %vm837_vm9, %vm891_vm1 }
  0x83   :  { %690 = vmatprep.subr.msk.mxu0 %vm93_vm8, %v448_v45 }
  0x84   :  { %691 = vmatpush1.msk.msra.mxu0 %vm93_vm8, %v447_v46  ;;  %v435_v50 = vpop.permute.xlu0 %434  ;;  %v437_v51 = vpop.permute.xlu1 %436 }
  0x85   :  { %v441_v53 = vsel %vm438_vm3, %v433_v19, %v435_v50  ;;  %692 = vmatprep.subr.msk.mxu0 %vm93_vm8, %v397_v49  ;;  %v442_v54 = vsel %vm438_vm3, %v435_v50, %v437_v51  ;;  %vm905_vm3 = vcmp.ge.s32.totalorder %v28_v37, 1 }
  0x86   :  { %693 = vmatpush1.msk.msra.mxu0 %vm93_vm8, %v388_v52  ;;  %v450_v56 = vsel %vm414_vm12, %v442_v54, 0.0  ;;  %v449_v57 = vsel %vm862_vm13, %v441_v53, 0.0 }
  0x87   :  { %694 = vmatprep.subr.msk.mxu0 %vm93_vm8, %v350_v55  ;;  %708 = vmatprep.subr.msk.mxu1 %vm93_vm8, %v450_v56  ;;  %v32_v56 = vand.u32 255, %v812_v28 }
  0x88   :  { %v331_v59 = vpop.permute.xlu0 %330  ;;  %709 = vmatpush1.msk.msra.mxu1 %vm93_vm8, %v449_v57  ;;  %v282_v60 = vpop.permute.xlu1 %281 }
  0x89   :  { %v341_v61 = vsel %vm340_vm7, %v331_v59, %v333_v39  ;;  %vm976_vm12 = vcmp.ge.s32.totalorder %v32_v56, 16 }
  0x8a   :  { %v349_v62 = vsel %vm878_vm14, %v341_v61, 0.0 }
  0x8b   :  { %695 = vmatpush1.msk.msra.mxu0 %vm93_vm8, %v349_v62 }
  0x8c   :  { %v284_v63 = vpop.permute.xlu0 %283  ;;  %v384_v2 = vpop.permute.xlu1 %383 }
  0x8d   :  { %v291_v5 = vsel %vm289_vm15, %v282_v60, %v284_v63  ;;  %v390_v14 = vsel %vm387_vm2, %v807_v22, %v384_v2 }
  0x8e   :  { %v299_v6 = vsel %vm816_vm0, %v291_v5, 0.0 }
  0x8f   :  { %696 = vmatprep.subr.msk.mxu0 %vm93_vm8, %v299_v6 }
  0x90   :  { %v386_v7 = vpop.permute.xlu0 %385  ;;  %v280_v8 = vpop.permute.xlu1 %279 }
  0x91   :  { %v391_v10 = vsel %vm387_vm2, %v384_v2, %v386_v7  ;;  %v290_v11 = vsel %vm289_vm15, %v280_v8, %v282_v60  ;;  %vm226_vm2 = vcmask 7168  }
  0x92   :  { %v399_v12 = vsel %vm837_vm9, %v391_v10, 0.0  ;;  %v298_v13 = vsel %vm832_vm6, %v290_v11, 0.0  ;;  %vm179_vm9 = vcmask 121856  }
  0x93   :  { %697 = vmatpush1.msk.msra.mxu0 %vm93_vm8, %v298_v13  ;;  %710 = vmatprep.subr.msk.mxu1 %vm93_vm8, %v399_v12 }
  0x94   :  { %v337_v16 = vpop.permute.xlu0 %336  ;;  %711 = vmatpush1.msk.msra.mxu1 %vm93_vm8, %v390_v14  ;;  %v339_v17 = vpop.permute.xlu1 %338  ;;  %698 = vmatprep.subr.msk.mxu0 %vm93_vm8, %v784_v3 }
  0x95   :  { %v343_v19 = vsel %vm340_vm7, %v814_v29, %v337_v16  ;;  %v344_v20 = vsel %vm340_vm7, %v337_v16, %v339_v17  ;;  %699 = vmatpush1.msk.msra.mxu0 %vm93_vm8, %v776_v1  ;;  %vm938_vm7 = vcmp.ge.s32.totalorder %v30_v27, 16 }
  0x96   :  { %v351_v21 = vsel %vm905_vm3, %v343_v19, 0.0  ;;  %v352_v22 = vsel %vm316_vm5, %v344_v20, 0.0  ;;  %vm152_vm11 = vmand %vm938_vm7, %vm832_vm6  ;;  %vm80_vm6 = vcmask 138240  }
  0x97   :  { %712 = vmatprep.subr.msk.mxu1 %vm93_vm8, %v352_v22  ;;  %vm154_vm5 = vmand %vm976_vm12, %vm862_vm13 }
  0x98   :  { %713 = vmatpush1.msk.msra.mxu1 %vm93_vm8, %v351_v21  ;;  %v221_v23 = vpop.permute.xlu1 %220  ;;  %v219_v24 = vpop.permute.xlu0 %218 }
  0x99   :  { %v228_v3 = vsel %vm226_vm2, %v219_v24, %v221_v23 }
  0x9a   :  { %v236_v25 = vsel %vm824_vm4, %v228_v3, 0.0 }
  0x9b   :  { %700 = vmatprep.subr.msk.mxu0 %vm93_vm8, %v236_v25 }
  0x9c   :  { %v288_v26 = vpop.permute.xlu1 %287  ;;  %v286_v1 = vpop.permute.xlu0 %285 }
  0x9d   :  { %v292_v29 = vsel %vm289_vm15, %v284_v63, %v286_v1  ;;  %v293_v30 = vsel %vm289_vm15, %v286_v1, %v288_v26  ;;  %vm53_vm15 = vmand %vm938_vm7, %vm878_vm14 }
  0x9e   :  { %v300_v32 = vsel %vm862_vm13, %v292_v29, 0.0  ;;  %v301_v33 = vsel %vm841_vm10, %v293_v30, 0.0  ;;  %vm661_vm13 = vcmask 3072  }
  0x9f   :  { %714 = vmatprep.subr.msk.mxu1 %vm93_vm8, %v301_v33 }
  0xa0   :  { %715 = vmatpush1.msk.msra.mxu1 %vm93_vm8, %v300_v32  ;;  %v217_v34 = vpop.permute.xlu0 %216  ;;  %v172_v37 = vpop.permute.xlu1 %171 }
  0xa1   :  { %v227_v18 = vsel %vm226_vm2, %v217_v34, %v219_v24  ;;  %716 = vmatprep.subr.msk.mxu1 %vm93_vm8, %v792_v4 }
  0xa2   :  { %v235_v39 = vsel %vm878_vm14, %v227_v18, 0.0  ;;  %717 = vmatpush1.msk.msra.mxu1 %vm93_vm8, %v771_v0  ;;  %vm676_vm14 = vcmask 11272  }
  0xa3   :  { %701 = vmatpush1.msk.msra.mxu0 %vm93_vm8, %v235_v39 }
  0xa4   :  { %v174_v40 = vpop.permute.xlu0 %173  ;;  %v170_v42 = vpop.permute.xlu1 %169 }
  0xa5   :  { %v181_v43 = vsel %vm179_vm9, %v172_v37, %v174_v40  ;;  %v180_v4 = vsel %vm179_vm9, %v170_v42, %v172_v37 }
  0xa6   :  { %v189_v44 = vsel %vm816_vm0, %v181_v43, 0.0  ;;  %v188_v45 = vsel %vm152_vm11, %v180_v4, 0.0  ;;  %vm128_vm0 = vcmask 130048  }
  0xa7   :  { %702 = vmatprep.subr.msk.mxu0 %vm93_vm8, %v189_v44 }
  0xa8   :  { %v223_v0 = vpop.permute.xlu0 %222  ;;  %703 = vmatpush1.msk.msra.mxu0 %vm93_vm8, %v188_v45  ;;  %v225_v46 = vpop.permute.xlu1 %224 }
  0xa9   :  { %v229_v36 = vsel %vm226_vm2, %v221_v23, %v223_v0  ;;  %v230_v47 = vsel %vm226_vm2, %v223_v0, %v225_v46 }
  0xaa   :  { %v237_v49 = vsel %vm905_vm3, %v229_v36, 0.0  ;;  %v238_v50 = vsel %vm891_vm1, %v230_v47, 0.0 }
  0xab   :  { %718 = vmatprep.subr.msk.mxu1 %vm93_vm8, %v238_v50 }
  0xac   :  { %719 = vmatpush1.msk.msra.mxu1 %vm93_vm8, %v237_v49  ;;  %v119_v31 = vpop.permute.xlu0 %118  ;;  %v121_v51 = vpop.permute.xlu1 %120 }
  0xad   :  { %v129_v52 = vsel %vm128_vm0, %v119_v31, %v121_v51 }
  0xae   :  { %v137_v57 = vsel %vm938_vm7, %v129_v52, 0.0 }
  0xb0   :  { %v123_v53 = vpop.permute.xlu0 %122  ;;  %v73_v54 = vpop.permute.xlu1 %72 }
  0xb1   :  { %v130_v55 = vsel %vm128_vm0, %v121_v51, %v123_v53 }
  0xb2   :  { %704 = vmatprep.subr.msk.mxu0 %vm93_vm8, %v130_v55 }
  0xb3   :  { %705 = vmatpush1.msk.msra.mxu0 %vm93_vm8, %v137_v57 }
  0xb4   :  { %v75_v59 = vpop.permute.xlu0 %74  ;;  %v176_v60 = vpop.permute.xlu1 %175 }
  0xb5   :  { %v82_v61 = vsel %vm80_vm6, %v73_v54, %v75_v59  ;;  %v182_v28 = vsel %vm179_vm9, %v174_v40, %v176_v60 }
  0xb6   :  { %v90_v63 = vsel %vm824_vm4, %v82_v61, 0.0  ;;  %vm495_vm4 = vcmask 588800   ;;  %v190_v8 = vsel %vm154_vm5, %v182_v28, 0.0 }
  0xb7   :  { %706 = vmatprep.subr.msk.mxu0 %vm93_vm8, %v90_v63 }
  0xb8   :  { %v178_v2 = vpop.permute.xlu0 %177  ;;  %v71_v5 = vpop.permute.xlu1 %70 }
  0xb9   :  { %v183_v6 = vsel %vm179_vm9, %v176_v60, %v178_v2  ;;  %v81_v35 = vsel %vm80_vm6, %v71_v5, %v73_v54 }
  0xba   :  { %v191_v7 = vsel %vm841_vm10, %v183_v6, 0.0  ;;  %v89_v48 = vsel %vm53_vm15, %v81_v35, 0.0  ;;  %vm55_vm10 = vmand %vm976_vm12, %vm905_vm3 }
  0xbb   :  { %707 = vmatpush1.msk.msra.mxu0 %vm93_vm8, %v89_v48  ;;  %720 = vmatprep.subr.msk.mxu1 %vm93_vm8, %v191_v7 }
  0xbc   :  { %v125_v10 = vpop.permute.xlu0 %124  ;;  %721 = vmatpush1.msk.msra.mxu1 %vm93_vm8, %v190_v8  ;;  %v127_v11 = vpop.permute.xlu1 %126  ;;  %687 = vmatmul.mubr.msk.f32.vlgmr.msra.gmra.mxu0 %vm495_vm4, %v20_v58 }
  0xbd   :  { %v131_v12 = vsel %vm128_vm0, %v123_v53, %v125_v10  ;;  %v132_v13 = vsel %vm128_vm0, %v125_v10, %v127_v11 }
  0xbe   :  { %v139_v41 = vsel %vm976_vm12, %v131_v12, 0.0  ;;  %722 = vmatprep.subr.msk.mxu1 %vm93_vm8, %v132_v13 }
  0xbf   :  { %723 = vmatpush1.msk.msra.mxu1 %vm93_vm8, %v139_v41 }
  0xc0   :  { %v77_v14 = vpop.permute.xlu0 %76  ;;  %v79_v16 = vpop.permute.xlu1 %78 }
  0xc1   :  { %v83_v17 = vsel %vm80_vm6, %v75_v59, %v77_v14  ;;  %v84_v19 = vsel %vm80_vm6, %v77_v14, %v79_v16 }
  0xc2   :  { %v91_v20 = vsel %vm55_vm10, %v83_v17, 0.0  ;;  %v92_v21 = vsel %vm891_vm1, %v84_v19, 0.0 }
  0xc3   :  { %724 = vmatprep.subr.msk.mxu1 %vm93_vm8, %v92_v21 }
  0xc4   :  { %725 = vmatpush1.msk.msra.mxu1 %vm93_vm8, %v91_v20 }
  0xc5   :  { %688 = vmatmul.mubr.msk.f32.vlgmr.msra.gmra.mxu1 %vm495_vm4, %v20_v58 }
 0x17c   :  { %v565_v15 = vpop.f32.mrf.mxu0 }
 0x17d   :  { %v663_v24 = vmul.f32 %v565_v15, %v565_v15  ;;  %v652_v25 = vsel %vm93_vm8, %v565_v15, 0.0 }
 0x17e   :  { %v567_v22 = vpop.f32.mrf.mxu0 }
 0x17f   :  { %v643_v23 = vcombine.low %v565_v15, %v567_v22  ;;  %v664_v3 = vmul.f32 %v567_v22, %v567_v22  ;;  %v653_v9 = vsel %vm93_vm8, %v567_v22, 0.0  ;;  %v667_v26 = vsel %vm93_vm8, %v663_v24, 0.0 }
 0x180   :  { %v654_v27 = vadd.f32 %v653_v9, %v652_v25 }
 0x181   :  { %645 = vst [vmem:[%s1042_s2] sm:$0xff] %v643_v23  ;;  %v668_v1 = vsel %vm93_vm8, %v664_v3, 0.0 }
 0x182   :  { %v669_v33 = vadd.f32 %v668_v1, %v667_v26 }
 0x185   :  { %v636_v29 = vpop.f32.mrf.mxu1 }
 0x186   :  { %v655_v30 = vsel %vm93_vm8, %v636_v29, 0.0  ;;  %v665_v32 = vmul.f32 %v636_v29, %v636_v29 }
 0x187   :  { %v638_v34 = vpop.f32.mrf.mxu1  ;;  %v656_v37 = vadd.f32 %v655_v30, %v654_v27 }
 0x188   :  { %v648_v38 = vcombine.low %v636_v29, %v638_v34  ;;  %v657_v18 = vsel %vm93_vm8, %v638_v34, 0.0  ;;  %v666_v39 = vmul.f32 %v638_v34, %v638_v34  ;;  %v670_v40 = vsel %vm93_vm8, %v665_v32, 0.0 }
 0x189   :  { %v658_v42 = vadd.f32 %v657_v18, %v656_v37  ;;  %v671_v43 = vadd.f32 %v670_v40, %v669_v33 }
 0x18a   :  { %689 = vst [vmem:[%s1042_s2 + $0x8] sm:$0xff] %v648_v38  ;;  %v672_v4 = vsel %vm93_vm8, %v666_v39, 0.0 }
 0x18b   :  { %659 = vadd.xlane.f32.xlu0 %v658_v42  ;;  %v673_v44 = vadd.f32 %v672_v4, %v671_v43 }
 0x18d   :  { %674 = vadd.xlane.f32.xlu1 %v673_v44 }
 0x214   :  { %v660_v45 = vpop.xlane.xlu0 %659 }
 0x215   :  { %662 = vst.msk [vmem:[%s1043_s3] sm:$0xf] %vm661_vm13, %v660_v45 }
 0x216   :  { %v675_v0 = vpop.xlane.xlu1 %674 }
 0x217   :  { %677 = vst.msk [vmem:[%s1043_s3] sm:$0xf] %vm676_vm14, %v675_v0 }

// kernel: resblock_forward.4
= control target key start
LH: loop header
LB: loop body
LE: loop exit
PB: predicated region body
PF: predicated region fallthrough
CT: control target
= control target key end

     0   :  { %s802_s23 = smov 1   ;;  %v803_v6 = vmov 0   ;;  %s804_s24 = smov 127   ;;  %v805_v8 = vmov 0.0   ;;  %v809_v19 = vmov 839922192   ;;  %v52_v21 = vlaneseq  ;;  %s1243_s1 = inlined_call_operand.vmem [shape: f32[1,4,2], index: 1, kind: input, shape index: {}]   ;;  %s1244_s2 = inlined_call_operand.vmem [shape: f32[4,1], index: 2, kind: input, shape index: {}]   ;;  %s1245_s3 = inlined_call_operand.vmem [shape: f32[4,1], index: 3, kind: input, shape index: {}]   ;;  %s1246_s0 = inlined_call_operand.vmem [shape: f32[2,4,256], index: 0, kind: input, shape index: {}]   ;;  %s1247_s4 = inlined_call_operand.vmem [shape: f32[4,72], index: 4, kind: input, shape index: {}]   ;;  %s1248_s5 = inlined_call_operand.vmem [shape: f32[2,4,256], index: 5, kind: output, shape index: {0}]   ;;  %s1249_s6 = inlined_call_operand.vmem [shape: f32[1,4,2], index: 6, kind: output, shape index: {1}]  }
   0x1   :  { %v24_v0 = vld [vmem:[%s1243_s1] sm:$0xf]  ;;  %796 = vset.pattern.permute.xlu1 %v803_v6  ;;  %797 = vset.pattern.permute.xlu0 %v803_v6  ;;  %23 = vst [vmem:[#allocation2 + $0x14] sm:$0xf] %v805_v8  ;;  %22 = vst [vmem:[#allocation2] sm:$0xf] %v805_v8  ;;  %v50_v20 = vunpack.c.l.s4 %v809_v19 }
   0x2   :  { %v26_v1 = vmul.f32 0.001953125, %v24_v0  ;;  %622 = vmatprep.mubr.f32.mxu0 %v805_v8  ;;  %693 = vmatprep.mubr.f32.mxu1 %v805_v8  ;;  %v33_v9 = vld [vmem:[%s1244_s2] sm:$0xf]  ;;  %s806_s28 = smov 112   ;;  %s807_s29 = smov 111   ;;  %v53_v23 = vshrl.u32 %v52_v21, 7 }
   0x3   :  { %v41_v12 = vld [vmem:[%s1245_s3] sm:$0xf]  ;;  %s808_s2 = smov 113   ;;  %v51_v22 = vunpack.c.0.s8 %v50_v20  ;;  %v745_v28 = vld [vmem:[%s1246_s0 + $0x8] sm:$0xff]  ;;  %s811_s9 = smov 17   ;;  %vm446_vm1 = vcmask 916480  }
   0x4   :  { %v27_v2 = vmul.f32 %v26_v1, %v26_v1  ;;  %v44_v27 = vld [vmem:[%s1246_s0] sm:$0xff]  ;;  %s810_s0 = smov 15   ;;  %s812_s10 = smov 16   ;;  %vm497_vm3 = vcmask 908288   ;;  %vm399_vm5 = vcmask 924672   ;;  %vm152_vm8 = vcmask 1043456  }
   0x5   :  { %v54_v24 = vsub.s32 %v51_v22, %v53_v23  ;;  %vm348_vm10 = vcmask 1039360  }
   0x6   :  { %29 = vrot.lane.b32.xlu0 %v27_v2, %s802_s23 }
   0x8   :  { %v422_v14 = vld [vmem:[#allocation2 + $0x14] sm:$0xf] }
   0x9   :  { %v469_v16 = vld [vmem:[#allocation2 + $0x14] sm:$0xf] }
   0xa   :  { %v371_v17 = vld [vmem:[#allocation2 + $0x14] sm:$0xf] }
   0xb   :  { %v324_v18 = vld [vmem:[#allocation2 + $0x14] sm:$0xf] }
  0x78   :  { %v30_v3 = vpop.permute.xlu0 %29 }
  0x79   :  { %v32_v4 = vsub.f32 %v26_v1, %v30_v3  ;;  %v966_v3 = vand.u32 127, %v52_v21 }
  0x7b   :  { %v34_v5 = vadd.f32 1e-05, %v32_v4  ;;  %v82_v6 = vadd.s32 128, %v966_v3 }
  0x7d   :  { %800 = vrsqrt.f32 %v34_v5 }
  0x8a   :  { %v801_v7 = vpop.eup %800 }
  0x8b   :  { %37 = vrot.lane.b32.xlu0 %v801_v7, %s804_s24 }
  0x8f   :  { %444 = vrot.lane.b32.xlu0 %v422_v14, %s806_s28 }
  0xfd   :  { %v38_v10 = vpop.permute.xlu0 %37 }
  0xfe   :  { %v40_v11 = vmul.f32 %v38_v10, %v33_v9  ;;  %v90_v9 = vand.u32 255, %v82_v6  ;;  %v84_v10 = vadd.s32 384, %v966_v3 }
 0x100   :  { %v42_v13 = vmul.f32 %v40_v11, %v26_v1  ;;  %47 = vperm.xlu1 %796, %v40_v11   ;;  %v86_v11 = vand.u32 15, %v82_v6  ;;  %vm979_vm0 = vcmp.lt.s32.totalorder %v90_v9, 240  ;;  %v92_v19 = vand.u32 255, %v84_v10 }
 0x101   :  { %v937_v50 = vpop.permute.xlu0 %444 }
 0x102   :  { %v43_v15 = vsub.f32 %v41_v12, %v42_v13  ;;  %v975_v12 = vadd.s32 256, %v966_v3  ;;  %vm984_vm2 = vcmp.le.s32.totalorder %v86_v11, 14  ;;  %vm988_vm4 = vcmp.ge.s32.totalorder %v86_v11, 1 }
 0x103   :  { %vm471_vm6 = vmand %vm979_vm0, %vm984_vm2  ;;  %vm1016_vm12 = vcmp.lt.s32.totalorder %v92_v19, 240 }
 0x104   :  { %60 = vperm.xlu1 %796, %v43_v15   ;;  %v88_v15 = vand.u32 15, %v84_v10  ;;  %v87_v21 = vand.u32 15, %v975_v12  ;;  %vm373_vm11 = vmand %vm979_vm0, %vm988_vm4 }
 0x106   :  { %vm1001_vm9 = vcmp.le.s32.totalorder %v88_v15, 14  ;;  %vm1031_vm15 = vcmp.le.s32.totalorder %v87_v21, 14 }
 0x107   :  { %vm473_vm14 = vmand %vm1016_vm12, %vm1001_vm9 }
 0x108   :  { %495 = vrot.lane.b32.xlu1 %v469_v16, %s807_s29 }
 0x10c   :  { %397 = vrot.lane.b32.xlu1 %v371_v17, %s808_s2  ;;  %v85_v17 = vand.u32 15, %v966_v3 }
 0x10e   :  { %vm997_vm7 = vcmp.le.s32.totalorder %v85_v17, 14  ;;  %vm1022_vm13 = vcmp.ge.s32.totalorder %v85_v17, 1 }
 0x110   :  { %346 = vrot.lane.b32.xlu1 %v324_v18, %s804_s24 }
 0x17b   :  { %v48_v25 = vpop.permute.xlu1 %47 }
 0x17c   :  { %v55_v26 = vrot.slane %v48_v25, %v54_v24 }
 0x17e   :  { %v57_v30 = vmul.f32 %v55_v26, %v44_v27  ;;  %v75_v31 = vmul.f32 %v745_v28, %v55_v26 }
 0x17f   :  { %v61_v29 = vpop.permute.xlu1 %60 }
 0x180   :  { %v68_v32 = vrot.slane %v61_v29, %v54_v24 }
 0x182   :  { %v70_v33 = vadd.f32 %v68_v32, %v57_v30  ;;  %v76_v34 = vadd.f32 %v75_v31, %v68_v32 }
 0x183   :  { %v931_v47 = vpop.permute.xlu1 %495 }
 0x184   :  { %v870_v35 = vmax.f32 %v70_v33, 0.0  ;;  %v872_v36 = vmax.f32 %v76_v34, 0.0 }
 0x186   :  { %72 = vst [vmem:[#allocation2 + $0x4] sm:$0xff] %v870_v35  ;;  %78 = vst [vmem:[#allocation2 + $0xc] sm:$0xff] %v872_v36  ;;  %491 = vrot.lane.b32.xlu1 %v872_v36, %s807_s29  ;;  %487 = vrot.lane.b32.xlu0 %v870_v35, %s807_s29  ;;  %v900_v41 = vcombine.high %v870_v35, %v870_v35  ;;  %v912_v43 = vcombine.high %v872_v36, %v872_v36 }
 0x187   :  { %v933_v48 = vpop.permute.xlu1 %397 }
 0x18a   :  { %440 = vrot.lane.b32.xlu0 %v872_v36, %s806_s28  ;;  %436 = vrot.lane.b32.xlu1 %v870_v35, %s806_s28 }
 0x18b   :  { %v935_v49 = vpop.permute.xlu1 %346 }
 0x18d   :  { %v260_v37 = vld [vmem:[#allocation2 + $0x8] sm:$0xff]  ;;  %v208_v38 = vld [vmem:[#allocation2] sm:$0xff]  ;;  %v261_v39 = vld [vmem:[#allocation2 + $0x10] sm:$0xf] }
 0x18e   :  { %393 = vrot.lane.b32.xlu0 %v872_v36, %s808_s2  ;;  %338 = vrot.lane.b32.xlu1 %v870_v35, %s804_s24  ;;  %v163_v40 = vld [vmem:[#allocation2 + $0x10] sm:$0xf]  ;;  %v226_v44 = vcombine.high %v208_v38, %v208_v38  ;;  %v274_v45 = vcombine.high %v260_v37, %v260_v37 }
 0x18f   :  { %v210_v42 = vld [vmem:[#allocation2 + $0x10] sm:$0xf] }
 0x190   :  { %v111_v46 = vld [vmem:[#allocation2 + $0x10] sm:$0xf] }
 0x192   :  { %389 = vrot.lane.b32.xlu0 %v870_v35, %s808_s2  ;;  %279 = vrot.lane.b32.xlu1 %v260_v37, %s802_s23 }
 0x196   :  { %342 = vrot.lane.b32.xlu0 %v872_v36, %s804_s24  ;;  %228 = vrot.lane.b32.xlu1 %v208_v38, %s810_s0 }
 0x19a   :  { %275 = vrot.lane.b32.xlu0 %v208_v38, %s802_s23  ;;  %283 = vrot.lane.b32.xlu1 %v261_v39, %s802_s23 }
 0x19e   :  { %232 = vrot.lane.b32.xlu0 %v260_v37, %s810_s0  ;;  %129 = vrot.lane.b32.xlu1 %v208_v38, %s811_s9 }
 0x1a2   :  { %177 = vrot.lane.b32.xlu0 %v208_v38, %s812_s10  ;;  %185 = vrot.lane.b32.xlu1 %v163_v40, %s812_s10 }
 0x1a6   :  { %181 = vrot.lane.b32.xlu0 %v260_v37, %s812_s10  ;;  %438 = vrot.lane.b32.xlu1 %v900_v41, %s806_s28 }
 0x1aa   :  { %133 = vrot.lane.b32.xlu0 %v260_v37, %s811_s9  ;;  %391 = vrot.lane.b32.xlu1 %v900_v41, %s808_s2 }
 0x1ae   :  { %236 = vrot.lane.b32.xlu0 %v210_v42, %s810_s0  ;;  %340 = vrot.lane.b32.xlu1 %v900_v41, %s804_s24 }
 0x1b2   :  { %489 = vrot.lane.b32.xlu0 %v900_v41, %s807_s29  ;;  %442 = vrot.lane.b32.xlu1 %v912_v43, %s806_s28 }
 0x1b6   :  { %493 = vrot.lane.b32.xlu0 %v912_v43, %s807_s29  ;;  %230 = vrot.lane.b32.xlu1 %v226_v44, %s810_s0 }
 0x1ba   :  { %395 = vrot.lane.b32.xlu0 %v912_v43, %s808_s2  ;;  %179 = vrot.lane.b32.xlu1 %v226_v44, %s812_s10 }
 0x1be   :  { %277 = vrot.lane.b32.xlu0 %v226_v44, %s802_s23  ;;  %131 = vrot.lane.b32.xlu1 %v226_v44, %s811_s9 }
 0x1c2   :  { %344 = vrot.lane.b32.xlu0 %v912_v43, %s804_s24  ;;  %234 = vrot.lane.b32.xlu1 %v274_v45, %s810_s0 }
 0x1c6   :  { %281 = vrot.lane.b32.xlu0 %v274_v45, %s802_s23  ;;  %137 = vrot.lane.b32.xlu1 %v111_v46, %s811_s9 }
 0x1ca   :  { %183 = vrot.lane.b32.xlu0 %v274_v45, %s812_s10 }
 0x1ce   :  { %135 = vrot.lane.b32.xlu0 %v274_v45, %s811_s9 }
 0x1f8   :  { %v939_v51 = vpop.permute.xlu1 %491  ;;  %v488_v52 = vpop.permute.xlu0 %487 }
 0x1fc   :  { %v941_v53 = vpop.permute.xlu0 %440  ;;  %v437_v54 = vpop.permute.xlu1 %436 }
 0x200   :  { %v943_v55 = vpop.permute.xlu0 %393  ;;  %v945_v56 = vpop.permute.xlu1 %338 }
 0x204   :  { %v390_v57 = vpop.permute.xlu0 %389  ;;  %v947_v58 = vpop.permute.xlu1 %279 }
 0x208   :  { %v949_v59 = vpop.permute.xlu0 %342  ;;  %v951_v60 = vpop.permute.xlu1 %228 }
 0x20c   :  { %v953_v61 = vpop.permute.xlu0 %275  ;;  %v955_v62 = vpop.permute.xlu1 %283 }
 0x210   :  { %v957_v63 = vpop.permute.xlu0 %232  ;;  %v959_v0 = vpop.permute.xlu1 %129 }
 0x214   :  { %v961_v1 = vpop.permute.xlu0 %177  ;;  %v963_v2 = vpop.permute.xlu1 %185 }
 0x218   :  { %v968_v4 = vpop.permute.xlu0 %181  ;;  %v439_v5 = vpop.permute.xlu1 %438 }
 0x219   :  { %v448_v26 = vsel %vm446_vm1, %v439_v5, %v941_v53  ;;  %v447_v37 = vsel %vm446_vm1, %v437_v54, %v439_v5 }
 0x21a   :  { %v456_v38 = vsel %vm979_vm0, %v448_v26, 0.0  ;;  %vm1073_vm0 = vcmp.ge.s32.totalorder %v87_v21, 1 }
 0x21c   :  { %v971_v7 = vpop.permute.xlu0 %133  ;;  %v392_v8 = vpop.permute.xlu1 %391 }
 0x21d   :  { %v401_v29 = vsel %vm399_vm5, %v392_v8, %v943_v55  ;;  %v400_v39 = vsel %vm399_vm5, %v390_v57, %v392_v8  ;;  %v89_v8 = vand.u32 255, %v966_v3 }
 0x21e   :  { %v409_v45 = vsel %vm373_vm11, %v401_v29, 0.0  ;;  %vm238_vm11 = vcmask 121856  }
 0x220   :  { %v977_v13 = vpop.permute.xlu0 %236  ;;  %v341_v14 = vpop.permute.xlu1 %340 }
 0x221   :  { %v350_v46 = vsel %vm348_vm10, %v341_v14, %v949_v59  ;;  %v349_v57 = vsel %vm348_vm10, %v945_v56, %v341_v14 }
 0x222   :  { %v358_v56 = vsel %vm984_vm2, %v350_v46, 0.0  ;;  %v357_v10 = vsel %vm997_vm7, %v349_v57, 0.0 }
 0x224   :  { %v490_v23 = vpop.permute.xlu0 %489  ;;  %v443_v24 = vpop.permute.xlu1 %442 }
 0x225   :  { %v498_v27 = vsel %vm497_vm3, %v488_v52, %v490_v23  ;;  %v499_v28 = vsel %vm497_vm3, %v490_v23, %v939_v51  ;;  %v450_v5 = vsel %vm446_vm1, %v443_v24, %v937_v50  ;;  %v449_v16 = vsel %vm446_vm1, %v941_v53, %v443_v24 }
 0x226   :  { %v507_v31 = vsel %vm471_vm6, %v499_v28, 0.0  ;;  %v506_v32 = vsel %vm997_vm7, %v498_v27, 0.0  ;;  %vm1040_vm6 = vcmp.ge.s32.totalorder %v88_v15, 1  ;;  %v458_v11 = vsel %vm1016_vm12, %v450_v5, 0.0 }
 0x227   :  { %749 = vmatprep.subr.msk.mxu0 %vm152_vm8, %v507_v31  ;;  %vm187_vm1 = vcmask 130048  }
 0x228   :  { %750 = vmatpush1.msk.msra.mxu0 %vm152_vm8, %v506_v32  ;;  %v494_v40 = vpop.permute.xlu0 %493  ;;  %v231_v42 = vpop.permute.xlu1 %230 }
 0x229   :  { %v500_v52 = vsel %vm497_vm3, %v939_v51, %v494_v40  ;;  %751 = vmatprep.subr.msk.mxu0 %vm152_vm8, %v456_v38  ;;  %v501_v54 = vsel %vm497_vm3, %v494_v40, %v931_v47  ;;  %v408_v47 = vsel %vm1022_vm13, %v400_v39, 0.0  ;;  %vm375_vm3 = vmand %vm1016_vm12, %vm1040_vm6  ;;  %vm285_vm12 = vcmask 7168   ;;  %v79_v39 = vld [vmem:[%s1247_s4] sm:$0xf] }
 0x22a   :  { %752 = vmatpush1.msk.msra.mxu0 %vm152_vm8, %v447_v37  ;;  %v509_v6 = vsel %vm473_vm14, %v501_v54, 0.0  ;;  %v508_v51 = vsel %vm1031_vm15, %v500_v52, 0.0  ;;  %vm1100_vm14 = vcmp.ge.s32.totalorder %v89_v8, 16 }
 0x22b   :  { %753 = vmatprep.subr.msk.mxu0 %vm152_vm8, %v409_v45  ;;  %767 = vmatprep.subr.msk.mxu1 %vm152_vm8, %v509_v6 }
 0x22c   :  { %768 = vmatpush1.msk.msra.mxu1 %vm152_vm8, %v508_v51  ;;  %v396_v3 = vpop.permute.xlu0 %395  ;;  %754 = vmatpush1.msk.msra.mxu0 %vm152_vm8, %v408_v47  ;;  %v180_v9 = vpop.permute.xlu1 %179 }
 0x22d   :  { %v402_v14 = vsel %vm399_vm5, %v943_v55, %v396_v3  ;;  %v403_v15 = vsel %vm399_vm5, %v396_v3, %v933_v48  ;;  %755 = vmatprep.subr.msk.mxu0 %vm152_vm8, %v358_v56  ;;  %769 = vmatprep.subr.msk.mxu1 %vm152_vm8, %v458_v11  ;;  %v240_v55 = vsel %vm238_vm11, %v231_v42, %v957_v63  ;;  %vm211_vm5 = vmand %vm1100_vm14, %vm997_vm7 }
 0x22e   :  { %v410_v17 = vsel %vm1073_vm0, %v402_v14, 0.0  ;;  %v411_v19 = vsel %vm375_vm3, %v403_v15, 0.0  ;;  %756 = vmatpush1.msk.msra.mxu0 %vm152_vm8, %v357_v10  ;;  %770 = vmatpush1.msk.msra.mxu1 %vm152_vm8, %v449_v16  ;;  %vm139_vm3 = vcmask 138240   ;;  %v248_v22 = vsel %vm984_vm2, %v240_v55, 0.0  ;;  %vm112_vm2 = vmand %vm1100_vm14, %vm1022_vm13 }
 0x22f   :  { %757 = vmatprep.subr.msk.mxu0 %vm152_vm8, %v900_v41  ;;  %771 = vmatprep.subr.msk.mxu1 %vm152_vm8, %v411_v19  ;;  %v188_v27 = vsel %vm187_vm1, %v961_v1, %v180_v9 }
 0x230   :  { %v278_v48 = vpop.permute.xlu0 %277  ;;  %758 = vmatpush1.msk.msra.mxu0 %vm152_vm8, %v870_v35  ;;  %v132_v53 = vpop.permute.xlu1 %131  ;;  %772 = vmatpush1.msk.msra.mxu1 %vm152_vm8, %v410_v17  ;;  %v239_v35 = vsel %vm238_vm11, %v951_v60, %v231_v42  ;;  %v196_v32 = vsel %vm1100_vm14, %v188_v27, 0.0 }
 0x231   :  { %v286_v23 = vsel %vm285_vm12, %v953_v61, %v278_v48  ;;  %v287_v24 = vsel %vm285_vm12, %v278_v48, %v947_v58  ;;  %v91_v61 = vand.u32 255, %v975_v12  ;;  %v247_v60 = vsel %vm211_vm5, %v239_v35, 0.0 }
 0x232   :  { %v294_v41 = vsel %vm1022_vm13, %v286_v23, 0.0  ;;  %v295_v26 = vsel %vm988_vm4, %v287_v24, 0.0  ;;  %v141_v29 = vsel %vm139_vm3, %v132_v53, %v971_v7  ;;  %v189_v12 = vsel %vm187_vm1, %v180_v9, %v968_v4 }
 0x233   :  { %759 = vmatprep.subr.msk.mxu0 %vm152_vm8, %v295_v26  ;;  %v140_v1 = vsel %vm139_vm3, %v959_v0, %v132_v53  ;;  %vm1156_vm7 = vcmp.ge.s32.totalorder %v91_v61, 16  ;;  %v149_v0 = vsel %vm988_vm4, %v141_v29, 0.0  ;;  %vm720_vm13 = vcmask 3072  }
 0x234   :  { %v345_v28 = vpop.permute.xlu0 %344  ;;  %760 = vmatpush1.msk.msra.mxu0 %vm152_vm8, %v294_v41  ;;  %v148_v40 = vsel %vm112_vm2, %v140_v1, 0.0  ;;  %vm213_vm4 = vmand %vm1156_vm7, %vm1031_vm15 }
 0x235   :  { %v351_v30 = vsel %vm348_vm10, %v949_v59, %v345_v28  ;;  %v352_v31 = vsel %vm348_vm10, %v345_v28, %v935_v49  ;;  %761 = vmatprep.subr.msk.mxu0 %vm152_vm8, %v248_v22  ;;  %v235_v49 = vpop.permute.xlu1 %234  ;;  %vm554_vm10 = vcmask 588800  }
 0x236   :  { %v359_v18 = vsel %vm1031_vm15, %v351_v30, 0.0  ;;  %v360_v59 = vsel %vm1001_vm9, %v352_v31, 0.0  ;;  %762 = vmatpush1.msk.msra.mxu0 %vm152_vm8, %v247_v60  ;;  %v242_v20 = vsel %vm238_vm11, %v235_v49, %v977_v13  ;;  %v241_v33 = vsel %vm238_vm11, %v957_v63, %v235_v49 }
 0x237   :  { %763 = vmatprep.subr.msk.mxu0 %vm152_vm8, %v189_v12  ;;  %773 = vmatprep.subr.msk.mxu1 %vm152_vm8, %v360_v59  ;;  %v249_v63 = vsel %vm213_vm4, %v241_v33, 0.0  ;;  %vm735_vm15 = vcmask 11272  }
 0x238   :  { %v282_v38 = vpop.permute.xlu0 %281  ;;  %764 = vmatpush1.msk.msra.mxu0 %vm152_vm8, %v196_v32  ;;  %774 = vmatpush1.msk.msra.mxu1 %vm152_vm8, %v359_v18 }
 0x239   :  { %v288_v42 = vsel %vm285_vm12, %v947_v58, %v282_v38  ;;  %v289_v45 = vsel %vm285_vm12, %v282_v38, %v955_v62  ;;  %765 = vmatprep.subr.msk.mxu0 %vm152_vm8, %v149_v0  ;;  %775 = vmatprep.subr.msk.mxu1 %vm152_vm8, %v912_v43  ;;  %v250_v43 = vsel %vm1001_vm9, %v242_v20, 0.0  ;;  %vm114_vm9 = vmand %vm1156_vm7, %vm1073_vm0  ;;  %v138_v25 = vpop.permute.xlu1 %137 }
 0x23a   :  { %v296_v13 = vsel %vm1073_vm0, %v288_v42, 0.0  ;;  %v297_v58 = vsel %vm1040_vm6, %v289_v45, 0.0  ;;  %766 = vmatpush1.msk.msra.mxu0 %vm152_vm8, %v148_v40  ;;  %776 = vmatpush1.msk.msra.mxu1 %vm152_vm8, %v872_v36 }
 0x23b   :  { %777 = vmatprep.subr.msk.mxu1 %vm152_vm8, %v297_v58  ;;  %746 = vmatmul.mubr.msk.f32.vlgmr.msra.gmra.mxu0 %vm554_vm10, %v79_v39 }
 0x23c   :  { %v184_v62 = vpop.permute.xlu0 %183  ;;  %778 = vmatpush1.msk.msra.mxu1 %vm152_vm8, %v296_v13 }
 0x23d   :  { %v190_v34 = vsel %vm187_vm1, %v968_v4, %v184_v62  ;;  %v191_v46 = vsel %vm187_vm1, %v184_v62, %v963_v2  ;;  %779 = vmatprep.subr.msk.mxu1 %vm152_vm8, %v250_v43 }
 0x23e   :  { %v198_v36 = vsel %vm1156_vm7, %v190_v34, 0.0  ;;  %780 = vmatpush1.msk.msra.mxu1 %vm152_vm8, %v249_v63 }
 0x23f   :  { %781 = vmatprep.subr.msk.mxu1 %vm152_vm8, %v191_v46 }
 0x240   :  { %v136_v52 = vpop.permute.xlu0 %135  ;;  %782 = vmatpush1.msk.msra.mxu1 %vm152_vm8, %v198_v36 }
 0x241   :  { %v142_v2 = vsel %vm139_vm3, %v971_v7, %v136_v52  ;;  %v143_v4 = vsel %vm139_vm3, %v136_v52, %v138_v25 }
 0x242   :  { %v150_v54 = vsel %vm114_vm9, %v142_v2, 0.0  ;;  %v151_v57 = vsel %vm1040_vm6, %v143_v4, 0.0 }
 0x243   :  { %783 = vmatprep.subr.msk.mxu1 %vm152_vm8, %v151_v57 }
 0x244   :  { %784 = vmatpush1.msk.msra.mxu1 %vm152_vm8, %v150_v54 }
 0x245   :  { %747 = vmatmul.mubr.msk.f32.vlgmr.msra.gmra.mxu1 %vm554_vm10, %v79_v39 }
 0x2fb   :  { %v624_v5 = vpop.f32.mrf.mxu0 }
 0x2fc   :  { %v722_v47 = vmul.f32 %v624_v5, %v624_v5  ;;  %v711_v8 = vsel %vm152_vm8, %v624_v5, 0.0 }
 0x2fd   :  { %v626_v6 = vpop.f32.mrf.mxu0 }
 0x2fe   :  { %v702_v51 = vcombine.low %v624_v5, %v626_v6  ;;  %v723_v7 = vmul.f32 %v626_v6, %v626_v6  ;;  %v712_v44 = vsel %vm152_vm8, %v626_v6, 0.0  ;;  %v726_v50 = vsel %vm152_vm8, %v722_v47, 0.0 }
 0x2ff   :  { %v713_v3 = vadd.f32 %v712_v44, %v711_v8 }
 0x300   :  { %704 = vst [vmem:[%s1248_s5] sm:$0xff] %v702_v51  ;;  %v727_v56 = vsel %vm152_vm8, %v723_v7, 0.0 }
 0x301   :  { %v728_v14 = vadd.f32 %v727_v56, %v726_v50 }
 0x305   :  { %v695_v9 = vpop.f32.mrf.mxu1 }
 0x306   :  { %v714_v10 = vsel %vm152_vm8, %v695_v9, 0.0  ;;  %v724_v11 = vmul.f32 %v695_v9, %v695_v9 }
 0x307   :  { %v697_v15 = vpop.f32.mrf.mxu1  ;;  %v715_v16 = vadd.f32 %v714_v10, %v713_v3 }
 0x308   :  { %v707_v17 = vcombine.low %v695_v9, %v697_v15  ;;  %v716_v19 = vsel %vm152_vm8, %v697_v15, 0.0  ;;  %v725_v21 = vmul.f32 %v697_v15, %v697_v15  ;;  %v729_v48 = vsel %vm152_vm8, %v724_v11, 0.0 }
 0x309   :  { %v717_v53 = vadd.f32 %v716_v19, %v715_v16  ;;  %v730_v55 = vadd.f32 %v729_v48, %v728_v14 }
 0x30a   :  { %748 = vst [vmem:[%s1248_s5 + $0x8] sm:$0xff] %v707_v17  ;;  %v731_v23 = vsel %vm152_vm8, %v725_v21, 0.0 }
 0x30b   :  { %718 = vadd.xlane.f32.xlu0 %v717_v53  ;;  %v732_v24 = vadd.f32 %v731_v23, %v730_v55 }
 0x30d   :  { %733 = vadd.xlane.f32.xlu1 %v732_v24 }
 0x394   :  { %v719_v35 = vpop.xlane.xlu0 %718 }
 0x395   :  { %721 = vst.msk [vmem:[%s1249_s6] sm:$0xf] %vm720_vm13, %v719_v35 }
 0x396   :  { %v734_v41 = vpop.xlane.xlu1 %733 }
 0x397   :  { %736 = vst.msk [vmem:[%s1249_s6] sm:$0xf] %vm735_vm15, %v734_v41 }

</bundles_post_ra>
